<compile_context>
chip_gen: v6e
topology: v6e:2x2x1
jax: 0.10.0
libtpu: 0.0.40
codegen_flags: <defaults>
</compile_context>

<pallas_src>
import jax
import jax.numpy as jnp
from jax.experimental import pallas as pl
from jax.experimental.pallas import tpu as pltpu

MAX_Q = 50

FUSED_ORDER = [
    "ew1", "eb1", "ew2", "eb2",                 # GNN.encoding_mlp (fused 2-branch)
    "w1a", "w1b", "m1b1", "m1w2", "m1b2",       # GNN.mlp1 (message MLP), m1w1 pre-split
    "m2w1", "m2b1", "m2w2", "m2b2",             # GNN.mlp2 (post-aggregation MLP)
    "hw1", "hb1", "hw2", "hb2",                 # Q head layers 1+2 (layer 3 done in glue)
]


def _round_up(x, m):
    return ((x + m - 1) // m) * m


def _block_diag(a, b):
    top = jnp.concatenate([a, jnp.zeros((a.shape[0], b.shape[1]), a.dtype)], axis=1)
    bot = jnp.concatenate([jnp.zeros((b.shape[0], a.shape[1]), b.dtype), b], axis=1)
    return jnp.concatenate([top, bot], axis=0)


# --------------------------------- Pallas kernel ---------------------------------------------
def gnn_twinq_kernel(node_ref, ssrc_ref, stgt_ref, stgtT_ref,
                     ew1_ref, eb1_ref, ew2_ref, eb2_ref,
                     w1a_ref, w1b_ref, m1b1_ref, m1w2_ref, m1b2_ref,
                     m2w1_ref, m2b1_ref, m2w2_ref, m2b2_ref,
                     hw1_ref, hb1_ref, hw2_ref, hb2_ref,
                     pen_ref, h_sc, agg_sc):
    f32 = jnp.float32
    bf16 = jnp.bfloat16
    e = pl.program_id(0)

    @pl.when(e == 0)
    def _init():
        # encoding_mlp on all (padded) nodes; both Q branches fused along the lane axis
        x = node_ref[...].astype(bf16)
        h = jnp.maximum(jnp.dot(x, ew1_ref[...], preferred_element_type=f32) + eb1_ref[...], 0.0)
        h = jnp.dot(h.astype(bf16), ew2_ref[...], preferred_element_type=f32) + eb2_ref[...]
        h_sc[...] = h.astype(bf16)                    # resident encoded features [N_pad, 2H]
        agg_sc[...] = jnp.zeros_like(agg_sc)          # scatter-sum accumulator

    h = h_sc[...]                                                     # [N_pad, 2H] bf16
    # per-edge gather via bf16 0/1 incidence matmuls (exact selection, f32 accumulate)
    x_i = jnp.dot(stgt_ref[...], h, preferred_element_type=f32)       # [tile_e, 2H] targets
    x_j = jnp.dot(ssrc_ref[...], h, preferred_element_type=f32)       # [tile_e, 2H] sources

    # message MLP on cat([x_i, x_j - x_i]); m1w1 pre-split into its two [2H, 2H] halves
    msg = jnp.maximum(
        jnp.dot(x_i.astype(bf16), w1a_ref[...], preferred_element_type=f32)
        + jnp.dot((x_j - x_i).astype(bf16), w1b_ref[...], preferred_element_type=f32)
        + m1b1_ref[...], 0.0)
    msg = jnp.dot(msg.astype(bf16), m1w2_ref[...], preferred_element_type=f32) + m1b2_ref[...]

    # aggr='sum' scatter into target nodes via the precomputed S_tgt^T tile (no transpose here)
    agg_sc[...] += jnp.dot(stgtT_ref[...], msg.astype(bf16), preferred_element_type=f32)

    @pl.when(e == pl.num_programs(0) - 1)
    def _final():
        agg = agg_sc[...]
        g = jnp.maximum(jnp.dot(agg.astype(bf16), m2w1_ref[...], preferred_element_type=f32)
                        + m2b1_ref[...], 0.0)
        g = jnp.dot(g.astype(bf16), m2w2_ref[...], preferred_element_type=f32) + m2b2_ref[...]
        q = jnp.maximum(jnp.dot(g.astype(bf16), hw1_ref[...], preferred_element_type=f32)
                        + hb1_ref[...], 0.0)
        q = jnp.maximum(jnp.dot(q.astype(bf16), hw2_ref[...], preferred_element_type=f32)
                        + hb2_ref[...], 0.0)
        pen_ref[...] = q                              # lane-dense [N_pad, 2H] output


def gnn_twinq_pallas(node_pad, s_src, s_tgt, s_tgt_t, fused, hidden_dim, tile_e):
    N_pad, C = node_pad.shape
    E_pad = s_src.shape[0]
    H2 = 2 * hidden_dim
    grid = (E_pad // tile_e,)

    def const(shape):
        n = len(shape)
        return pl.BlockSpec(shape, lambda e: (0,) * n)

    in_specs = [
        const((N_pad, C)),                                   # node features (resident)
        pl.BlockSpec((tile_e, N_pad), lambda e: (e, 0)),     # S_src edge tile
        pl.BlockSpec((tile_e, N_pad), lambda e: (e, 0)),     # S_tgt edge tile
        pl.BlockSpec((N_pad, tile_e), lambda e: (0, e)),     # S_tgt^T edge tile
    ] + [const(fused[k].shape) for k in FUSED_ORDER]

    out_specs = pl.BlockSpec((N_pad, H2), lambda e: (0, 0))

    return pl.pallas_call(
        gnn_twinq_kernel,
        out_shape=jax.ShapeDtypeStruct((N_pad, H2), jnp.float32),
        grid_spec=pltpu.PrefetchScalarGridSpec(
            num_scalar_prefetch=0,
            grid=grid,
            in_specs=in_specs,
            out_specs=out_specs,
            scratch_shapes=[pltpu.VMEM((N_pad, H2), jnp.bfloat16),   # encoded node features h
                            pltpu.VMEM((N_pad, H2), jnp.float32)],   # scatter-sum accumulator
        ),
        compiler_params=pltpu.CompilerParams(
            dimension_semantics=("arbitrary",),          # edge axis is a reduction
            vmem_limit_bytes=48 * 1024 * 1024,           # headroom under v7x's 64 MiB VMEM
        ),
    )(node_pad, s_src, s_tgt, s_tgt_t, *[fused[k] for k in FUSED_ORDER])


# ---------------------------- twin-branch parameter fusion (glue) ----------------------------
def fuse_twinq_params(p1, p2, hidden_dim):
    """Pack both Q branches into 2H-wide bf16 weights (block-diag) and f32 biases."""
    H = hidden_dim
    bf16 = jnp.bfloat16

    def cat_b(a, b):
        return jnp.concatenate([a, b], axis=1).astype(jnp.float32)

    def bd(a, b):
        return _block_diag(a, b).astype(bf16)

    return {
        "ew1": jnp.concatenate([p1["ew1"], p2["ew1"]], axis=1).astype(bf16),  # shared input
        "eb1": cat_b(p1["eb1"], p2["eb1"]),
        "ew2": bd(p1["ew2"], p2["ew2"]),
        "eb2": cat_b(p1["eb2"], p2["eb2"]),
        "w1a": bd(p1["m1w1"][:H, :], p2["m1w1"][:H, :]),     # x_i half
        "w1b": bd(p1["m1w1"][H:, :], p2["m1w1"][H:, :]),     # (x_j - x_i) half
        "m1b1": cat_b(p1["m1b1"], p2["m1b1"]),
        "m1w2": bd(p1["m1w2"], p2["m1w2"]),
        "m1b2": cat_b(p1["m1b2"], p2["m1b2"]),
        "m2w1": bd(p1["m2w1"], p2["m2w1"]),
        "m2b1": cat_b(p1["m2b1"], p2["m2b1"]),
        "m2w2": bd(p1["m2w2"], p2["m2w2"]),
        "m2b2": cat_b(p1["m2b2"], p2["m2b2"]),
        "hw1": bd(p1["hw1"], p2["hw1"]),
        "hb1": cat_b(p1["hb1"], p2["hb1"]),
        "hw2": bd(p1["hw2"], p2["hw2"]),
        "hb2": cat_b(p1["hb2"], p2["hb2"]),
    }


# --------------------------------- forward pass (glue + kernel) ------------------------------
def gnn_q_network_forward(obs, action, params1, params2, hidden_dim, clip_q_function=False):
    node, robot_state, edge_index, node_type, node_num = obs
    N = node.shape[0]
    E = edge_index.shape[1]
    H = hidden_dim

    # xu = cat([robot_state, action], 1).repeat_interleave(node_num, dim=0)
    xu = jnp.concatenate([robot_state, action], axis=1)
    xu = jnp.repeat(xu, node_num, axis=0, total_repeat_length=N)
    node_full = jnp.concatenate([node, xu], axis=1).astype(jnp.float32)     # [N, C]
    C = node_full.shape[1]

    # pad nodes to a sublane multiple; tile/pad edges so the grid tiles divide evenly
    N_pad = _round_up(N, 16)
    E16 = _round_up(E, 16)
    if E16 <= 256:
        tile_e, E_pad = E16, E16
    else:
        tile_e = 256
        E_pad = _round_up(E, tile_e)

    node_pad = jnp.zeros((N_pad, C), jnp.float32).at[:N].set(node_full)

    # bf16 one-hot incidence matrices (exact 0/1); padded edges (index -1) are all-zero rows,
    # so their garbage messages never reach the accumulator.
    src = jnp.full((E_pad,), -1, jnp.int32).at[:E].set(edge_index[0])       # sources (x_j)
    tgt = jnp.full((E_pad,), -1, jnp.int32).at[:E].set(edge_index[1])       # targets (x_i)
    s_src = jax.nn.one_hot(src, N_pad, dtype=jnp.bfloat16)                  # [E_pad, N_pad]
    s_tgt = jax.nn.one_hot(tgt, N_pad, dtype=jnp.bfloat16)                  # [E_pad, N_pad]
    s_tgt_t = s_tgt.T                                                       # [N_pad, E_pad]

    fused = fuse_twinq_params(params1, params2, H)
    pen = gnn_twinq_pallas(node_pad, s_src, s_tgt, s_tgt_t, fused, H, tile_e)  # [N_pad, 2H]

    # agent-row selection (commutes with the row-wise MLPs) + tiny final [H,1] heads in glue
    agent_index = jnp.where(node_type == 0)[0]   # concrete outside jit (matches torch.where)
    pen_a = pen[agent_index]
    x1 = pen_a[:, :H] @ params1["hw3"] + params1["hb3"]
    x2 = pen_a[:, H:] @ params2["hw3"] + params2["hb3"]
    if clip_q_function:
        x1 = jnp.minimum(x1, jnp.float32(MAX_Q))
        x2 = jnp.minimum(x2, jnp.float32(MAX_Q))
    return x1, x2


# ---------------- deterministic parameter init (xavier_uniform weights, zero bias) ------------
def _xavier(key, fan_in, fan_out):
    bound = (6.0 / (fan_in + fan_out)) ** 0.5
    return jax.random.uniform(key, (fan_in, fan_out), jnp.float32, -bound, bound)


def init_branch_params(key, in_dim, hidden_dim):
    H = hidden_dim
    ks = jax.random.split(key, 9)
    z = lambda n: jnp.zeros((1, n), jnp.float32)
    return {
        "ew1": _xavier(ks[0], in_dim, H), "eb1": z(H),
        "ew2": _xavier(ks[1], H, H),      "eb2": z(H),
        "m1w1": _xavier(ks[2], 2 * H, H), "m1b1": z(H),
        "m1w2": _xavier(ks[3], H, H),     "m1b2": z(H),
        "m2w1": _xavier(ks[4], H, H),     "m2b1": z(H),
        "m2w2": _xavier(ks[5], H, H),     "m2b2": z(H),
        "hw1": _xavier(ks[6], H, H),      "hb1": z(H),
        "hw2": _xavier(ks[7], H, H),      "hb2": z(H),
        "hw3": _xavier(ks[8], H, 1),      "hb3": z(1),
    }


# ---------------- pure-JAX f32 reference (scatter via segment_sum) for a sanity check ---------
def _ref_branch(node_full, edge_index, p):
    lin = lambda x, w, b: x @ w + b
    h = jnp.maximum(lin(node_full, p["ew1"], p["eb1"]), 0.0)
    h = lin(h, p["ew2"], p["eb2"])
    src, tgt = edge_index[0], edge_index[1]
    x_j, x_i = h[src], h[tgt]
    tmp = jnp.concatenate([x_i, x_j - x_i], axis=1)
    msg = jnp.maximum(lin(tmp, p["m1w1"], p["m1b1"]), 0.0)
    msg = lin(msg, p["m1w2"], p["m1b2"])
    agg = jax.ops.segment_sum(msg, tgt, num_segments=node_full.shape[0])
    g = jnp.maximum(lin(agg, p["m2w1"], p["m2b1"]), 0.0)
    g = lin(g, p["m2w2"], p["m2b2"])
    q = jnp.maximum(lin(g, p["hw1"], p["hb1"]), 0.0)
    q = jnp.maximum(lin(q, p["hw2"], p["hb2"]), 0.0)
    return lin(q, p["hw3"], p["hb3"])


def reference_forward(obs, action, params1, params2):
    node, robot_state, edge_index, node_type, node_num = obs
    N = node.shape[0]
    xu = jnp.concatenate([robot_state, action], axis=1)
    xu = jnp.repeat(xu, node_num, axis=0, total_repeat_length=N)
    node_full = jnp.concatenate([node, xu], axis=1).astype(jnp.float32)
    agent_index = jnp.where(node_type == 0)[0]
    r1 = _ref_branch(node_full, edge_index, params1)[agent_index]
    r2 = _ref_branch(node_full, edge_index, params2)[agent_index]
    return r1, r2


if __name__ == "__main__":
    key = jax.random.PRNGKey(0)
    in_channels, state_dim, num_actions, hidden_dim = 6, 5, 3, 32
    C = in_channels + state_dim + num_actions   # 14
    B = 2                                       # batch of graphs
    node_num_py = [11, 13]                      # nodes per graph
    node_num = jnp.array(node_num_py, jnp.int32)
    N = sum(node_num_py)                        # 24 nodes total

    k1, k2, k3, kp1, kp2 = jax.random.split(key, 5)
    node = jax.random.normal(k1, (N, in_channels), jnp.float32)
    robot_state = jax.random.normal(k2, (B, state_dim), jnp.float32)
    action = jax.random.normal(k3, (B, num_actions), jnp.float32)

    # fully-connected directed edges (no self loops) within each graph -> E = 266 (2 edge tiles)
    src_list, tgt_list = [], []
    start = 0
    for n in node_num_py:
        for a in range(start, start + n):
            for b in range(start, start + n):
                if a != b:
                    src_list.append(a)          # source j
                    tgt_list.append(b)          # target i (aggregation index)
        start += n
    edge_index = jnp.array([src_list, tgt_list], jnp.int32)         # [2, E]

    # one agent node (type 0) per graph
    node_type = jnp.ones((N,), jnp.int32).at[jnp.array([0, node_num_py[0]])].set(0)

    params1 = init_branch_params(kp1, C, hidden_dim)
    params2 = init_branch_params(kp2, C, hidden_dim)

    obs = (node, robot_state, edge_index, node_type, node_num)
    x1, x2 = gnn_q_network_forward(obs, action, params1, params2, hidden_dim,
                                   clip_q_function=False)
    jax.block_until_ready((x1, x2))

    r1, r2 = reference_forward(obs, action, params1, params2)
    assert x1.shape == (2, 1) and x2.shape == (2, 1)
    # tolerance accounts for bf16 matmul operands (f32 accumulation) vs. the all-f32 reference
    assert jnp.allclose(x1, r1, atol=5e-2, rtol=5e-2), (x1, r1)
    assert jnp.allclose(x2, r2, atol=5e-2, rtol=5e-2), (x2, r2)
    print("KERNEL_OK")
</pallas_src>

<mosaic_0001>
module attributes {stable_mosaic.version = 11 : i64} {
  func.func @gnn_twinq_kernel(%arg0: i32, %arg1: memref<32x14xf32, #tpu.memory_space<vmem>>, %arg2: memref<256x32xbf16, #tpu.memory_space<vmem>>, %arg3: memref<256x32xbf16, #tpu.memory_space<vmem>>, %arg4: memref<32x256xbf16, #tpu.memory_space<vmem>>, %arg5: memref<14x64xbf16, #tpu.memory_space<vmem>>, %arg6: memref<1x64xf32, #tpu.memory_space<vmem>>, %arg7: memref<64x64xbf16, #tpu.memory_space<vmem>>, %arg8: memref<1x64xf32, #tpu.memory_space<vmem>>, %arg9: memref<64x64xbf16, #tpu.memory_space<vmem>>, %arg10: memref<64x64xbf16, #tpu.memory_space<vmem>>, %arg11: memref<1x64xf32, #tpu.memory_space<vmem>>, %arg12: memref<64x64xbf16, #tpu.memory_space<vmem>>, %arg13: memref<1x64xf32, #tpu.memory_space<vmem>>, %arg14: memref<64x64xbf16, #tpu.memory_space<vmem>>, %arg15: memref<1x64xf32, #tpu.memory_space<vmem>>, %arg16: memref<64x64xbf16, #tpu.memory_space<vmem>>, %arg17: memref<1x64xf32, #tpu.memory_space<vmem>>, %arg18: memref<64x64xbf16, #tpu.memory_space<vmem>>, %arg19: memref<1x64xf32, #tpu.memory_space<vmem>>, %arg20: memref<64x64xbf16, #tpu.memory_space<vmem>>, %arg21: memref<1x64xf32, #tpu.memory_space<vmem>>, %arg22: memref<32x64xf32, #tpu.memory_space<vmem>>, %arg23: memref<32x64xbf16, #tpu.memory_space<vmem>>, %arg24: memref<32x64xf32, #tpu.memory_space<vmem>>) attributes {dimension_semantics = [#tpu.dimension_semantics<arbitrary>], iteration_bounds = array<i64: 2>, scalar_prefetch = 0 : i64, scratch_operands = 2 : i64, tpu.core_type = #tpu.core_type<tc>, window_params = [{pipeline_mode = #tpu.pipeline_mode<synchronous>, transform_indices = @transform_0, window_bounds = array<i64: 32, 14>}, {transform_indices = @transform_1, window_bounds = array<i64: 256, 32>}, {transform_indices = @transform_2, window_bounds = array<i64: 256, 32>}, {transform_indices = @transform_3, window_bounds = array<i64: 32, 256>}, {pipeline_mode = #tpu.pipeline_mode<synchronous>, transform_indices = @transform_4, window_bounds = array<i64: 14, 64>}, {pipeline_mode = #tpu.pipeline_mode<synchronous>, transform_indices = @transform_5, window_bounds = array<i64: 1, 64>}, {pipeline_mode = #tpu.pipeline_mode<synchronous>, transform_indices = @transform_6, window_bounds = array<i64: 64, 64>}, {pipeline_mode = #tpu.pipeline_mode<synchronous>, transform_indices = @transform_7, window_bounds = array<i64: 1, 64>}, {pipeline_mode = #tpu.pipeline_mode<synchronous>, transform_indices = @transform_8, window_bounds = array<i64: 64, 64>}, {pipeline_mode = #tpu.pipeline_mode<synchronous>, transform_indices = @transform_9, window_bounds = array<i64: 64, 64>}, {pipeline_mode = #tpu.pipeline_mode<synchronous>, transform_indices = @transform_10, window_bounds = array<i64: 1, 64>}, {pipeline_mode = #tpu.pipeline_mode<synchronous>, transform_indices = @transform_11, window_bounds = array<i64: 64, 64>}, {pipeline_mode = #tpu.pipeline_mode<synchronous>, transform_indices = @transform_12, window_bounds = array<i64: 1, 64>}, {pipeline_mode = #tpu.pipeline_mode<synchronous>, transform_indices = @transform_13, window_bounds = array<i64: 64, 64>}, {pipeline_mode = #tpu.pipeline_mode<synchronous>, transform_indices = @transform_14, window_bounds = array<i64: 1, 64>}, {pipeline_mode = #tpu.pipeline_mode<synchronous>, transform_indices = @transform_15, window_bounds = array<i64: 64, 64>}, {pipeline_mode = #tpu.pipeline_mode<synchronous>, transform_indices = @transform_16, window_bounds = array<i64: 1, 64>}, {pipeline_mode = #tpu.pipeline_mode<synchronous>, transform_indices = @transform_17, window_bounds = array<i64: 64, 64>}, {pipeline_mode = #tpu.pipeline_mode<synchronous>, transform_indices = @transform_18, window_bounds = array<i64: 1, 64>}, {pipeline_mode = #tpu.pipeline_mode<synchronous>, transform_indices = @transform_19, window_bounds = array<i64: 64, 64>}, {pipeline_mode = #tpu.pipeline_mode<synchronous>, transform_indices = @transform_20, window_bounds = array<i64: 1, 64>}, {pipeline_mode = #tpu.pipeline_mode<synchronous>, transform_indices = @transform_21, window_bounds = array<i64: 32, 64>}]} {
    %c0_i32 = arith.constant 0 : i32
    %0 = arith.cmpi eq, %arg0, %c0_i32 : i32
    %1 = arith.extui %0 : i1 to i32
    %c0_i32_0 = arith.constant 0 : i32
    %2 = arith.cmpi ne, %1, %c0_i32_0 : i32
    scf.if %2 {
      %c0_29 = arith.constant 0 : index
      %c0_30 = arith.constant 0 : index
      %36 = vector.load %arg1[%c0_29, %c0_30] : memref<32x14xf32, #tpu.memory_space<vmem>>, vector<32x14xf32>
      %37 = arith.truncf %36 : vector<32x14xf32> to vector<32x14xbf16>
      %c0_31 = arith.constant 0 : index
      %c0_32 = arith.constant 0 : index
      %38 = vector.load %arg5[%c0_31, %c0_32] : memref<14x64xbf16, #tpu.memory_space<vmem>>, vector<14x64xbf16>
      %cst_33 = arith.constant dense<0.000000e+00> : vector<32x64xf32>
      %39 = tpu.matmul %37, %38, %cst_33 {dimension_numbers = #tpu.dot_dimension_numbers<[1], [0], [0], [1], [0, 0, 1, 1], [], []>} : vector<32x14xbf16>, vector<14x64xbf16>, vector<32x64xf32> -> vector<32x64xf32>
      %c0_34 = arith.constant 0 : index
      %c0_35 = arith.constant 0 : index
      %40 = vector.load %arg6[%c0_34, %c0_35] : memref<1x64xf32, #tpu.memory_space<vmem>>, vector<1x64xf32>
      %41 = vector.broadcast %40 : vector<1x64xf32> to vector<32x64xf32>
      %42 = arith.addf %39, %41 : vector<32x64xf32>
      %cst_36 = arith.constant 0.000000e+00 : f32
      %43 = vector.broadcast %cst_36 : f32 to vector<32x64xf32>
      %44 = arith.maximumf %42, %43 : vector<32x64xf32>
      %45 = arith.truncf %44 : vector<32x64xf32> to vector<32x64xbf16>
      %c0_37 = arith.constant 0 : index
      %c0_38 = arith.constant 0 : index
      %46 = vector.load %arg7[%c0_37, %c0_38] : memref<64x64xbf16, #tpu.memory_space<vmem>>, vector<64x64xbf16>
      %cst_39 = arith.constant dense<0.000000e+00> : vector<32x64xf32>
      %47 = tpu.matmul %45, %46, %cst_39 {dimension_numbers = #tpu.dot_dimension_numbers<[1], [0], [0], [1], [0, 0, 1, 1], [], []>} : vector<32x64xbf16>, vector<64x64xbf16>, vector<32x64xf32> -> vector<32x64xf32>
      %c0_40 = arith.constant 0 : index
      %c0_41 = arith.constant 0 : index
      %48 = vector.load %arg8[%c0_40, %c0_41] : memref<1x64xf32, #tpu.memory_space<vmem>>, vector<1x64xf32>
      %49 = vector.broadcast %48 : vector<1x64xf32> to vector<32x64xf32>
      %50 = arith.addf %47, %49 : vector<32x64xf32>
      %51 = arith.truncf %50 : vector<32x64xf32> to vector<32x64xbf16>
      %c0_42 = arith.constant 0 : index
      %c0_43 = arith.constant 0 : index
      %52 = vector.load %arg23[%c0_42, %c0_43] : memref<32x64xbf16, #tpu.memory_space<vmem>>, vector<32x64xbf16>
      tpu.vector_store %arg23[%c0_42, %c0_43], %51 {strides = array<i32>} : memref<32x64xbf16, #tpu.memory_space<vmem>>, vector<32x64xbf16>,
      %cst_44 = arith.constant 0.000000e+00 : f32
      %53 = vector.broadcast %cst_44 : f32 to vector<32x64xf32>
      %c0_45 = arith.constant 0 : index
      %c0_46 = arith.constant 0 : index
      %54 = vector.load %arg24[%c0_45, %c0_46] : memref<32x64xf32, #tpu.memory_space<vmem>>, vector<32x64xf32>
      tpu.vector_store %arg24[%c0_45, %c0_46], %53 {strides = array<i32>} : memref<32x64xf32, #tpu.memory_space<vmem>>, vector<32x64xf32>,
    } else {
    }
    %c0 = arith.constant 0 : index
    %c0_1 = arith.constant 0 : index
    %3 = vector.load %arg23[%c0, %c0_1] : memref<32x64xbf16, #tpu.memory_space<vmem>>, vector<32x64xbf16>
    %c0_2 = arith.constant 0 : index
    %c0_3 = arith.constant 0 : index
    %4 = vector.load %arg3[%c0_2, %c0_3] : memref<256x32xbf16, #tpu.memory_space<vmem>>, vector<256x32xbf16>
    %cst = arith.constant dense<0.000000e+00> : vector<256x64xf32>
    %5 = tpu.matmul %4, %3, %cst {dimension_numbers = #tpu.dot_dimension_numbers<[1], [0], [0], [1], [0, 0, 1, 1], [], []>} : vector<256x32xbf16>, vector<32x64xbf16>, vector<256x64xf32> -> vector<256x64xf32>
    %c0_4 = arith.constant 0 : index
    %c0_5 = arith.constant 0 : index
    %6 = vector.load %arg2[%c0_4, %c0_5] : memref<256x32xbf16, #tpu.memory_space<vmem>>, vector<256x32xbf16>
    %cst_6 = arith.constant dense<0.000000e+00> : vector<256x64xf32>
    %7 = tpu.matmul %6, %3, %cst_6 {dimension_numbers = #tpu.dot_dimension_numbers<[1], [0], [0], [1], [0, 0, 1, 1], [], []>} : vector<256x32xbf16>, vector<32x64xbf16>, vector<256x64xf32> -> vector<256x64xf32>
    %8 = arith.truncf %5 : vector<256x64xf32> to vector<256x64xbf16>
    %c0_7 = arith.constant 0 : index
    %c0_8 = arith.constant 0 : index
    %9 = vector.load %arg9[%c0_7, %c0_8] : memref<64x64xbf16, #tpu.memory_space<vmem>>, vector<64x64xbf16>
    %cst_9 = arith.constant dense<0.000000e+00> : vector<256x64xf32>
    %10 = tpu.matmul %8, %9, %cst_9 {dimension_numbers = #tpu.dot_dimension_numbers<[1], [0], [0], [1], [0, 0, 1, 1], [], []>} : vector<256x64xbf16>, vector<64x64xbf16>, vector<256x64xf32> -> vector<256x64xf32>
    %11 = arith.subf %7, %5 : vector<256x64xf32>
    %12 = arith.truncf %11 : vector<256x64xf32> to vector<256x64xbf16>
    %c0_10 = arith.constant 0 : index
    %c0_11 = arith.constant 0 : index
    %13 = vector.load %arg10[%c0_10, %c0_11] : memref<64x64xbf16, #tpu.memory_space<vmem>>, vector<64x64xbf16>
    %cst_12 = arith.constant dense<0.000000e+00> : vector<256x64xf32>
    %14 = tpu.matmul %12, %13, %cst_12 {dimension_numbers = #tpu.dot_dimension_numbers<[1], [0], [0], [1], [0, 0, 1, 1], [], []>} : vector<256x64xbf16>, vector<64x64xbf16>, vector<256x64xf32> -> vector<256x64xf32>
    %15 = arith.addf %10, %14 : vector<256x64xf32>
    %c0_13 = arith.constant 0 : index
    %c0_14 = arith.constant 0 : index
    %16 = vector.load %arg11[%c0_13, %c0_14] : memref<1x64xf32, #tpu.memory_space<vmem>>, vector<1x64xf32>
    %17 = vector.broadcast %16 : vector<1x64xf32> to vector<256x64xf32>
    %18 = arith.addf %15, %17 : vector<256x64xf32>
    %cst_15 = arith.constant 0.000000e+00 : f32
    %19 = vector.broadcast %cst_15 : f32 to vector<256x64xf32>
    %20 = arith.maximumf %18, %19 : vector<256x64xf32>
    %21 = arith.truncf %20 : vector<256x64xf32> to vector<256x64xbf16>
    %c0_16 = arith.constant 0 : index
    %c0_17 = arith.constant 0 : index
    %22 = vector.load %arg12[%c0_16, %c0_17] : memref<64x64xbf16, #tpu.memory_space<vmem>>, vector<64x64xbf16>
    %cst_18 = arith.constant dense<0.000000e+00> : vector<256x64xf32>
    %23 = tpu.matmul %21, %22, %cst_18 {dimension_numbers = #tpu.dot_dimension_numbers<[1], [0], [0], [1], [0, 0, 1, 1], [], []>} : vector<256x64xbf16>, vector<64x64xbf16>, vector<256x64xf32> -> vector<256x64xf32>
    %c0_19 = arith.constant 0 : index
    %c0_20 = arith.constant 0 : index
    %24 = vector.load %arg13[%c0_19, %c0_20] : memref<1x64xf32, #tpu.memory_space<vmem>>, vector<1x64xf32>
    %25 = vector.broadcast %24 : vector<1x64xf32> to vector<256x64xf32>
    %26 = arith.addf %23, %25 : vector<256x64xf32>
    %c0_21 = arith.constant 0 : index
    %c0_22 = arith.constant 0 : index
    %27 = vector.load %arg24[%c0_21, %c0_22] : memref<32x64xf32, #tpu.memory_space<vmem>>, vector<32x64xf32>
    %c0_23 = arith.constant 0 : index
    %c0_24 = arith.constant 0 : index
    %28 = vector.load %arg4[%c0_23, %c0_24] : memref<32x256xbf16, #tpu.memory_space<vmem>>, vector<32x256xbf16>
    %29 = arith.truncf %26 : vector<256x64xf32> to vector<256x64xbf16>
    %cst_25 = arith.constant dense<0.000000e+00> : vector<32x64xf32>
    %30 = tpu.matmul %28, %29, %cst_25 {dimension_numbers = #tpu.dot_dimension_numbers<[1], [0], [0], [1], [0, 0, 1, 1], [], []>} : vector<32x256xbf16>, vector<256x64xbf16>, vector<32x64xf32> -> vector<32x64xf32>
    %31 = arith.addf %27, %30 : vector<32x64xf32>
    %c0_26 = arith.constant 0 : index
    %c0_27 = arith.constant 0 : index
    %32 = vector.load %arg24[%c0_26, %c0_27] : memref<32x64xf32, #tpu.memory_space<vmem>>, vector<32x64xf32>
    tpu.vector_store %arg24[%c0_26, %c0_27], %31 {strides = array<i32>} : memref<32x64xf32, #tpu.memory_space<vmem>>, vector<32x64xf32>,
    %c1_i32 = arith.constant 1 : i32
    %33 = arith.cmpi eq, %arg0, %c1_i32 : i32
    %34 = arith.extui %33 : i1 to i32
    %c0_i32_28 = arith.constant 0 : i32
    %35 = arith.cmpi ne, %34, %c0_i32_28 : i32
    scf.if %35 {
      %c0_29 = arith.constant 0 : index
      %c0_30 = arith.constant 0 : index
      %36 = vector.load %arg24[%c0_29, %c0_30] : memref<32x64xf32, #tpu.memory_space<vmem>>, vector<32x64xf32>
      %37 = arith.truncf %36 : vector<32x64xf32> to vector<32x64xbf16>
      %c0_31 = arith.constant 0 : index
      %c0_32 = arith.constant 0 : index
      %38 = vector.load %arg14[%c0_31, %c0_32] : memref<64x64xbf16, #tpu.memory_space<vmem>>, vector<64x64xbf16>
      %cst_33 = arith.constant dense<0.000000e+00> : vector<32x64xf32>
      %39 = tpu.matmul %37, %38, %cst_33 {dimension_numbers = #tpu.dot_dimension_numbers<[1], [0], [0], [1], [0, 0, 1, 1], [], []>} : vector<32x64xbf16>, vector<64x64xbf16>, vector<32x64xf32> -> vector<32x64xf32>
      %c0_34 = arith.constant 0 : index
      %c0_35 = arith.constant 0 : index
      %40 = vector.load %arg15[%c0_34, %c0_35] : memref<1x64xf32, #tpu.memory_space<vmem>>, vector<1x64xf32>
      %41 = vector.broadcast %40 : vector<1x64xf32> to vector<32x64xf32>
      %42 = arith.addf %39, %41 : vector<32x64xf32>
      %cst_36 = arith.constant 0.000000e+00 : f32
      %43 = vector.broadcast %cst_36 : f32 to vector<32x64xf32>
      %44 = arith.maximumf %42, %43 : vector<32x64xf32>
      %45 = arith.truncf %44 : vector<32x64xf32> to vector<32x64xbf16>
      %c0_37 = arith.constant 0 : index
      %c0_38 = arith.constant 0 : index
      %46 = vector.load %arg16[%c0_37, %c0_38] : memref<64x64xbf16, #tpu.memory_space<vmem>>, vector<64x64xbf16>
      %cst_39 = arith.constant dense<0.000000e+00> : vector<32x64xf32>
      %47 = tpu.matmul %45, %46, %cst_39 {dimension_numbers = #tpu.dot_dimension_numbers<[1], [0], [0], [1], [0, 0, 1, 1], [], []>} : vector<32x64xbf16>, vector<64x64xbf16>, vector<32x64xf32> -> vector<32x64xf32>
      %c0_40 = arith.constant 0 : index
      %c0_41 = arith.constant 0 : index
      %48 = vector.load %arg17[%c0_40, %c0_41] : memref<1x64xf32, #tpu.memory_space<vmem>>, vector<1x64xf32>
      %49 = vector.broadcast %48 : vector<1x64xf32> to vector<32x64xf32>
      %50 = arith.addf %47, %49 : vector<32x64xf32>
      %51 = arith.truncf %50 : vector<32x64xf32> to vector<32x64xbf16>
      %c0_42 = arith.constant 0 : index
      %c0_43 = arith.constant 0 : index
      %52 = vector.load %arg18[%c0_42, %c0_43] : memref<64x64xbf16, #tpu.memory_space<vmem>>, vector<64x64xbf16>
      %cst_44 = arith.constant dense<0.000000e+00> : vector<32x64xf32>
      %53 = tpu.matmul %51, %52, %cst_44 {dimension_numbers = #tpu.dot_dimension_numbers<[1], [0], [0], [1], [0, 0, 1, 1], [], []>} : vector<32x64xbf16>, vector<64x64xbf16>, vector<32x64xf32> -> vector<32x64xf32>
      %c0_45 = arith.constant 0 : index
      %c0_46 = arith.constant 0 : index
      %54 = vector.load %arg19[%c0_45, %c0_46] : memref<1x64xf32, #tpu.memory_space<vmem>>, vector<1x64xf32>
      %55 = vector.broadcast %54 : vector<1x64xf32> to vector<32x64xf32>
      %56 = arith.addf %53, %55 : vector<32x64xf32>
      %cst_47 = arith.constant 0.000000e+00 : f32
      %57 = vector.broadcast %cst_47 : f32 to vector<32x64xf32>
      %58 = arith.maximumf %56, %57 : vector<32x64xf32>
      %59 = arith.truncf %58 : vector<32x64xf32> to vector<32x64xbf16>
      %c0_48 = arith.constant 0 : index
      %c0_49 = arith.constant 0 : index
      %60 = vector.load %arg20[%c0_48, %c0_49] : memref<64x64xbf16, #tpu.memory_space<vmem>>, vector<64x64xbf16>
      %cst_50 = arith.constant dense<0.000000e+00> : vector<32x64xf32>
      %61 = tpu.matmul %59, %60, %cst_50 {dimension_numbers = #tpu.dot_dimension_numbers<[1], [0], [0], [1], [0, 0, 1, 1], [], []>} : vector<32x64xbf16>, vector<64x64xbf16>, vector<32x64xf32> -> vector<32x64xf32>
      %c0_51 = arith.constant 0 : index
      %c0_52 = arith.constant 0 : index
      %62 = vector.load %arg21[%c0_51, %c0_52] : memref<1x64xf32, #tpu.memory_space<vmem>>, vector<1x64xf32>
      %63 = vector.broadcast %62 : vector<1x64xf32> to vector<32x64xf32>
      %64 = arith.addf %61, %63 : vector<32x64xf32>
      %cst_53 = arith.constant 0.000000e+00 : f32
      %65 = vector.broadcast %cst_53 : f32 to vector<32x64xf32>
      %66 = arith.maximumf %64, %65 : vector<32x64xf32>
      %c0_54 = arith.constant 0 : index
      %c0_55 = arith.constant 0 : index
      %67 = vector.load %arg22[%c0_54, %c0_55] : memref<32x64xf32, #tpu.memory_space<vmem>>, vector<32x64xf32>
      tpu.vector_store %arg22[%c0_54, %c0_55], %66 {strides = array<i32>} : memref<32x64xf32, #tpu.memory_space<vmem>>, vector<32x64xf32>,
    } else {
    }
    return
  }
  func.func @transform_0(%arg0: i32) -> (i32, i32) {
    %c0_i32 = arith.constant 0 : i32
    %c0_i32_0 = arith.constant 0 : i32
    %c0_i32_1 = arith.constant 0 : i32
    return %c0_i32, %c0_i32_0 : i32, i32
  }
  func.func @transform_1(%arg0: i32) -> (i32, i32) {
    %c0_i32 = arith.constant 0 : i32
    %c0_i32_0 = arith.constant 0 : i32
    return %arg0, %c0_i32 : i32, i32
  }
  func.func @transform_2(%arg0: i32) -> (i32, i32) {
    %c0_i32 = arith.constant 0 : i32
    %c0_i32_0 = arith.constant 0 : i32
    return %arg0, %c0_i32 : i32, i32
  }
  func.func @transform_3(%arg0: i32) -> (i32, i32) {
    %c0_i32 = arith.constant 0 : i32
    %c0_i32_0 = arith.constant 0 : i32
    return %c0_i32, %arg0 : i32, i32
  }
  func.func @transform_4(%arg0: i32) -> (i32, i32) {
    %c0_i32 = arith.constant 0 : i32
    %c0_i32_0 = arith.constant 0 : i32
    %c0_i32_1 = arith.constant 0 : i32
    return %c0_i32, %c0_i32_0 : i32, i32
  }
  func.func @transform_5(%arg0: i32) -> (i32, i32) {
    %c0_i32 = arith.constant 0 : i32
    %c0_i32_0 = arith.constant 0 : i32
    %c0_i32_1 = arith.constant 0 : i32
    return %c0_i32, %c0_i32_0 : i32, i32
  }
  func.func @transform_6(%arg0: i32) -> (i32, i32) {
    %c0_i32 = arith.constant 0 : i32
    %c0_i32_0 = arith.constant 0 : i32
    %c0_i32_1 = arith.constant 0 : i32
    return %c0_i32, %c0_i32_0 : i32, i32
  }
  func.func @transform_7(%arg0: i32) -> (i32, i32) {
    %c0_i32 = arith.constant 0 : i32
    %c0_i32_0 = arith.constant 0 : i32
    %c0_i32_1 = arith.constant 0 : i32
    return %c0_i32, %c0_i32_0 : i32, i32
  }
  func.func @transform_8(%arg0: i32) -> (i32, i32) {
    %c0_i32 = arith.constant 0 : i32
    %c0_i32_0 = arith.constant 0 : i32
    %c0_i32_1 = arith.constant 0 : i32
    return %c0_i32, %c0_i32_0 : i32, i32
  }
  func.func @transform_9(%arg0: i32) -> (i32, i32) {
    %c0_i32 = arith.constant 0 : i32
    %c0_i32_0 = arith.constant 0 : i32
    %c0_i32_1 = arith.constant 0 : i32
    return %c0_i32, %c0_i32_0 : i32, i32
  }
  func.func @transform_10(%arg0: i32) -> (i32, i32) {
    %c0_i32 = arith.constant 0 : i32
    %c0_i32_0 = arith.constant 0 : i32
    %c0_i32_1 = arith.constant 0 : i32
    return %c0_i32, %c0_i32_0 : i32, i32
  }
  func.func @transform_11(%arg0: i32) -> (i32, i32) {
    %c0_i32 = arith.constant 0 : i32
    %c0_i32_0 = arith.constant 0 : i32
    %c0_i32_1 = arith.constant 0 : i32
    return %c0_i32, %c0_i32_0 : i32, i32
  }
  func.func @transform_12(%arg0: i32) -> (i32, i32) {
    %c0_i32 = arith.constant 0 : i32
    %c0_i32_0 = arith.constant 0 : i32
    %c0_i32_1 = arith.constant 0 : i32
    return %c0_i32, %c0_i32_0 : i32, i32
  }
  func.func @transform_13(%arg0: i32) -> (i32, i32) {
    %c0_i32 = arith.constant 0 : i32
    %c0_i32_0 = arith.constant 0 : i32
    %c0_i32_1 = arith.constant 0 : i32
    return %c0_i32, %c0_i32_0 : i32, i32
  }
  func.func @transform_14(%arg0: i32) -> (i32, i32) {
    %c0_i32 = arith.constant 0 : i32
    %c0_i32_0 = arith.constant 0 : i32
    %c0_i32_1 = arith.constant 0 : i32
    return %c0_i32, %c0_i32_0 : i32, i32
  }
  func.func @transform_15(%arg0: i32) -> (i32, i32) {
    %c0_i32 = arith.constant 0 : i32
    %c0_i32_0 = arith.constant 0 : i32
    %c0_i32_1 = arith.constant 0 : i32
    return %c0_i32, %c0_i32_0 : i32, i32
  }
  func.func @transform_16(%arg0: i32) -> (i32, i32) {
    %c0_i32 = arith.constant 0 : i32
    %c0_i32_0 = arith.constant 0 : i32
    %c0_i32_1 = arith.constant 0 : i32
    return %c0_i32, %c0_i32_0 : i32, i32
  }
  func.func @transform_17(%arg0: i32) -> (i32, i32) {
    %c0_i32 = arith.constant 0 : i32
    %c0_i32_0 = arith.constant 0 : i32
    %c0_i32_1 = arith.constant 0 : i32
    return %c0_i32, %c0_i32_0 : i32, i32
  }
  func.func @transform_18(%arg0: i32) -> (i32, i32) {
    %c0_i32 = arith.constant 0 : i32
    %c0_i32_0 = arith.constant 0 : i32
    %c0_i32_1 = arith.constant 0 : i32
    return %c0_i32, %c0_i32_0 : i32, i32
  }
  func.func @transform_19(%arg0: i32) -> (i32, i32) {
    %c0_i32 = arith.constant 0 : i32
    %c0_i32_0 = arith.constant 0 : i32
    %c0_i32_1 = arith.constant 0 : i32
    return %c0_i32, %c0_i32_0 : i32, i32
  }
  func.func @transform_20(%arg0: i32) -> (i32, i32) {
    %c0_i32 = arith.constant 0 : i32
    %c0_i32_0 = arith.constant 0 : i32
    %c0_i32_1 = arith.constant 0 : i32
    return %c0_i32, %c0_i32_0 : i32, i32
  }
  func.func @transform_21(%arg0: i32) -> (i32, i32) {
    %c0_i32 = arith.constant 0 : i32
    %c0_i32_0 = arith.constant 0 : i32
    %c0_i32_1 = arith.constant 0 : i32
    return %c0_i32, %c0_i32_0 : i32, i32
  }
}

</mosaic_0001>

<bundles_post_ra>
// kernel: tpu_custom_call.1
= control target key start
LH: loop header
LB: loop body
LE: loop exit
PB: predicated region body
PF: predicated region fallthrough
CT: control target
= control target key end

     0   :  { %s4534_s0 = inlined_call_operand.vmem [shape: f32[32,14], index: 0, kind: input, shape index: {}]   ;;  %s4535_s1 = inlined_call_operand.vmem [shape: bf16[512,32], index: 1, kind: input, shape index: {}]   ;;  %s4536_s2 = inlined_call_operand.vmem [shape: bf16[512,32], index: 2, kind: input, shape index: {}]   ;;  %s4537_s3 = inlined_call_operand.vmem [shape: bf16[32,512], index: 3, kind: input, shape index: {}]   ;;  %s4538_s4 = inlined_call_operand.vmem [shape: bf16[14,64], index: 4, kind: input, shape index: {}]   ;;  %s4539_s5 = inlined_call_operand.vmem [shape: f32[1,64], index: 5, kind: input, shape index: {}]   ;;  %s4540_s6 = inlined_call_operand.vmem [shape: bf16[64,64], index: 6, kind: input, shape index: {}]   ;;  %s4541_s7 = inlined_call_operand.vmem [shape: f32[1,64], index: 7, kind: input, shape index: {}]   ;;  %s4542_s8 = inlined_call_operand.vmem [shape: bf16[64,64], index: 8, kind: input, shape index: {}]   ;;  %s4543_s9 = inlined_call_operand.vmem [shape: bf16[64,64], index: 9, kind: input, shape index: {}]   ;;  %s4544_s10 = inlined_call_operand.vmem [shape: f32[1,64], index: 10, kind: input, shape index: {}]   ;;  %s4545_s11 = inlined_call_operand.vmem [shape: bf16[64,64], index: 11, kind: input, shape index: {}]   ;;  %s4546_s12 = inlined_call_operand.vmem [shape: f32[1,64], index: 12, kind: input, shape index: {}]   ;;  %s4547_s13 = inlined_call_operand.vmem [shape: bf16[64,64], index: 13, kind: input, shape index: {}]   ;;  %s4548_s14 = inlined_call_operand.vmem [shape: f32[1,64], index: 14, kind: input, shape index: {}]   ;;  %s4549_s15 = inlined_call_operand.vmem [shape: bf16[64,64], index: 15, kind: input, shape index: {}]   ;;  %s4550_s16 = inlined_call_operand.vmem [shape: f32[1,64], index: 16, kind: input, shape index: {}]   ;;  %s4551_s17 = inlined_call_operand.vmem [shape: bf16[64,64], index: 17, kind: input, shape index: {}]   ;;  %s4552_s18 = inlined_call_operand.vmem [shape: f32[1,64], index: 18, kind: input, shape index: {}]   ;;  %s4553_s19 = inlined_call_operand.vmem [shape: bf16[64,64], index: 19, kind: input, shape index: {}]   ;;  %s4554_s20 = inlined_call_operand.vmem [shape: f32[1,64], index: 20, kind: input, shape index: {}]   ;;  %s4555_s21 = inlined_call_operand.hbm [shape: f32[32,64], index: 21, kind: output, shape index: {}]  }
   0x1   :  { %4560 = sst [smem:[#allocation11_spill]] %s4534_s0 }
   0x2   :  { %4561 = sst [smem:[#allocation12_spill]] %s4535_s1 }
   0x3   :  { %4562 = sst [smem:[#allocation13_spill]] %s4536_s2 }
   0x4   :  { %4563 = sst [smem:[#allocation14_spill]] %s4537_s3 }
   0x5   :  { %4564 = sst [smem:[#allocation15_spill]] %s4538_s4 }
   0x6   :  { %4565 = sst [smem:[#allocation16_spill]] %s4539_s5 }
   0x7   :  { %4566 = sst [smem:[#allocation17_spill]] %s4554_s20 }
   0x8   :  { %4567 = sst [smem:[#allocation18_spill]] %s4555_s21 }
   0x9   :  { %26 = vsyncpa [#allocation6], 0  ;;  %s3966_s2 = smov 0   ;;  %s3968_s25 = smov 0  }
   0xa   :  { %s3970_s26 = smov 0  }
   0xb LB: > { %4568 = sst [smem:[#allocation8_spill]] %s3846_s25  ;;  %s3982_s27 = sadd.s32 4294967295, %s3850_s26   ;;  %s3850_s26 = sphi %s3970_s26, %s4579_s26   ;;  %s3846_s25 = sphi %s3968_s25, %s4581_s25   ;;  %s3842_s2 = sphi %s3966_s2, %s4580_s2  }
   0xc   : > { %s3985_s3 = sadd.s32 1, %s3850_s26   ;;  %s112_s29 = sadd.s32 1, %s3846_s25 }
   0xd   : > { %4569 = sst [smem:[#allocation9_spill]] %s3985_s3  ;;  %s109_s28 = ssub.s32 %s3850_s26, %s3985_s3 }
   0xe   : > { %p110_p0 = scmp.eq.s32.totalorder %s109_s28, 0  ;;  %p119_p1 = scmp.ne.s32.totalorder %s3846_s25, %s3842_s2 }
   0xf   : > { %p120_p2 = scmp.eq.s32.totalorder %s3850_s26, 0  ;;  %p3077_p4 = scmp.ge.s32.totalorder %s3850_s26, 2 }
  0x10   : > { %s3994_s0 = scalar_select %p110_p0, %s3846_s25, %s112_s29  }
  0x11   : > { %p121_p3 = por %p120_p2, %p119_p1  ;;  %577 = sbr.rel (%p3077_p4) target bundleno = 34 (0x22), region = 88 }
  0x12   : > { %4570 = sst [smem:[#allocation10_spill]] %s3994_s0 }
  0x16   : > { %598 = sbr.rel (!%p121_p3) target bundleno = 34 (0x22), region = 100  ;;  %s600_s4 = sand.u32 (%p121_p3), 1, %s3846_s25  }
  0x17   : > { %s3268_s30 = sshll.u32 (%p121_p3), %s3850_s26, 3  ;;  %s3078_s5 = sshll.u32 (%p121_p3), %s600_s4, 5 }
  0x18   : > { %s4571_s1 = sld [smem:[#allocation14_spill]] (%p121_p3)  ;;  %s602_s28 = scalar_lea.vmem (%p121_p3), [#allocation4], %s3078_s5 }
  0x1e   : > { %s605_s24 = scalar_lea.vmem %s4571_s1, %s3268_s30 }
  0x1f   : > { %v640_v0 = vld [vmem:[%s605_s24] sm:$0xff]  ;;  %v642_v1 = vld [vmem:[%s605_s24 + $0x10] sm:$0xff] }
  0x20   : > { %v644_v2 = vld [vmem:[%s605_s24 + $0x20] sm:$0xff]  ;;  %641 = vst [vmem:[%s602_s28] sm:$0xff] %v640_v0  ;;  %643 = vst [vmem:[%s602_s28 + $0x8] sm:$0xff] %v642_v1  ;;  %v646_v3 = vld [vmem:[%s605_s24 + $0x30] sm:$0xff] }
  0x21   : > { %645 = vst [vmem:[%s602_s28 + $0x10] sm:$0xff] %v644_v2  ;;  %647 = vst [vmem:[%s602_s28 + $0x18] sm:$0xff] %v646_v3 }
  0x22 PF: > { %p3081_p5 = scmp.ge.s32.totalorder %s3850_s26, 1  ;;  %p652_p6 = scmp.lt.s32.totalorder %s3850_s26, 3 }
  0x24   : > { %p653_p7 = pnand %p3081_p5, %p652_p6 }
  0x25   : > { %s659_s29 = sand.u32 (!%p653_p7), 1, %s3842_s2   ;;  %s3083_s4 = sshll.u32 (!%p653_p7), %s3982_s27, 5 }
  0x26   : > { %656 = sbr.rel (%p653_p7) target bundleno = 2274 (0x8e2), region = 138  ;;  %s3082_s30 = sshll.u32 (!%p653_p7), %s659_s29, 5 }
  0x27   : > { %p724_p8 = scmp.lt.s32.totalorder (!%p653_p7), %s3083_s4, 63  ;;  %s4572_s1 = sld [smem:[#allocation12_spill]] (!%p653_p7) }
  0x28   : > { %s4573_s25 = sld [smem:[#allocation13_spill]] (!%p653_p7)  ;;  %s4016_s26 = scalar_lea.vmem (!%p653_p7), [#allocation4], %s3082_s30 }
  0x29   : > { %p3087_p9 = scmp.ne.s32.totalorder (!%p653_p7), %s3982_s27, 0 }
  0x2b   : > { %s4583_s4 = smov (!%p724_p8, %s3083_s4), 63  ;;  %740 = sbr.rel (%p3087_p9) target bundleno = 465 (0x1d1), region = 146 }
  0x2c   : > { %s3084_s5 = sshll.u32 %s4583_s4, 2  ;;  %s4574_s21 = sld [smem:[#allocation15_spill]] (!%p3087_p9) }
  0x2d   : > { %s4009_s24 = scalar_lea.vmem %s4572_s1, %s3084_s5  ;;  %s4575_s22 = sld [smem:[#allocation11_spill]] (!%p3087_p9) }
  0x2e   : > { %s4014_s3 = scalar_lea.vmem %s4573_s25, %s3084_s5  ;;  %s4576_s30 = sld [smem:[#allocation16_spill]] (!%p3087_p9) }
  0x30   : > { %vm768_vm0 = vcmask 1046528   ;;  %vm761_vm1 = vcmask 113664   ;;  %v3728_v12 = vld [vmem:[%s4540_s6 + $0x18] sm:$0xff]   ;;  %v3729_v13 = vld [vmem:[%s4540_s6 + $0x10] sm:$0xff]   ;;  %v3730_v14 = vld [vmem:[%s4540_s6 + $0x8] sm:$0xff]   ;;  %vm866_vm2 = vcmask 523264  }
  0x31   : > { %3436 = vmatprep.subr.bf16.mxu1 %v3728_v12  ;;  %v3731_v15 = vld [vmem:[%s4540_s6] sm:$0xff]   ;;  %v3852_v16 = vmov 0.0   ;;  %vm938_vm3 = vcmask 519168  }
  0x32   : > { %v3727_v4 = vld [vmem:[%s4574_s21] sm:$0x7f]   ;;  %3437 = vmatpush3.bf16.msra.mxu1 %v3728_v12  ;;  %943 = vst.msk [vmem:[#allocation3] sm:$0xff] %vm866_vm2, %v3852_v16  ;;  %944 = vst.msk [vmem:[#allocation3 + $0x8] sm:$0xff] %vm866_vm2, %v3852_v16 }
  0x33   : > { %v741_v5 = vld [vmem:[%s4575_s22] sm:$0xff]  ;;  %v742_v6 = vld [vmem:[%s4575_s22 + $0x8] sm:$0xff]  ;;  %v743_v7 = vld [vmem:[%s4575_s22 + $0x10] sm:$0xff]  ;;  %3692 = vmatprep.subr.msk.bf16.mxu0 %vm768_vm0, %v3727_v4  ;;  %v770_v8 = vsel %vm768_vm0, %v3727_v4, 0  ;;  %3438 = vmatprep.subr.bf16.mxu1 %v3729_v13  ;;  %945 = vst.msk [vmem:[#allocation3 + $0x10] sm:$0xff] %vm866_vm2, %v3852_v16 }
  0x34   : > { %v745_v9 = vpack.c.bf16 %v742_v6, %v741_v5  ;;  %v744_v10 = vld [vmem:[%s4575_s22 + $0x18] sm:$0xff]  ;;  %3431 = vmatpush3.bf16.msra.mxu0 %v770_v8  ;;  %946 = vst.msk [vmem:[#allocation3 + $0x18] sm:$0xff] %vm866_vm2, %v3852_v16  ;;  %v3088_v19 = vld [vmem:[%s4576_s30] ss:$0 sm:$0xff] }
  0x35   : > { %v746_v11 = vpack.c.bf16 %v744_v10, %v743_v7  ;;  %v3092_v32 = vld [vmem:[%s4541_s7] ss:$0 sm:$0xff] }
  0x36   : > { %3432 = vmatprep.mubr.msk.bf16.mxu0 %vm761_vm1, %v745_v9  ;;  %3439 = vmatpush3.bf16.msra.mxu1 %v3729_v13 }
  0x37   : > { %3433 = vmatmul.mubr.msk.bf16.vlgmr.msra.gmra.mxu0 %vm761_vm1, %v746_v11  ;;  %3440 = vmatprep.subr.bf16.mxu1 %v3730_v14 }
  0x3a   : > { %3441 = vmatpush3.bf16.msra.mxu1 %v3730_v14 }
  0x3b   : > { %3442 = vmatprep.subr.bf16.mxu1 %v3731_v15 }
  0x3e   : > { %3443 = vmatpush3.bf16.msra.mxu1 %v3731_v15 }
  0xf7   : > { %v3434_v17 = vpop.f32.mrf.mxu0 }
  0xf8   : > { %v815_v23 = vadd.f32 %v3434_v17, %v3088_v19 }
  0xf9   : > { %v806_v18 = vpop.f32.mrf.mxu0 }
  0xfa   : > { %v807_v21 = vadd.f32 %v3088_v19, %v806_v18  ;;  %v823_v29 = vmax.f32 %v815_v23, 0.0 }
  0xfb   : > { %v3435_v20 = vpop.f32.mrf.mxu0 }
  0xfc   : > { %v818_v22 = vadd.f32 %v3435_v20, %v3088_v19  ;;  %v821_v27 = vmax.f32 %v807_v21, 0.0 }
  0xfd   : > { %v809_v24 = vpop.f32.mrf.mxu0 }
  0xfe   : > { %v810_v25 = vadd.f32 %v3088_v19, %v809_v24  ;;  %v824_v26 = vmax.f32 %v818_v22, 0.0 }
 0x100   : > { %v822_v28 = vmax.f32 %v810_v25, 0.0  ;;  %v826_v31 = vpack.c.bf16 %v824_v26, %v823_v29 }
 0x102   : > { %v825_v30 = vpack.c.bf16 %v822_v28, %v821_v27 }
 0x104   : > { %3444 = vmatprep.mubr.msk.bf16.mxu1 %vm866_vm2, %v825_v30 }
 0x105   : > { %3445 = vmatmul.mubr.msk.bf16.vlgmr.msra.gmra.mxu1 %vm866_vm2, %v826_v31 }
 0x1c5   : > { %v3446_v33 = vpop.f32.mrf.mxu1 }
 0x1c6   : > { %v916_v34 = vadd.f32 %v3446_v33, %v3092_v32 }
 0x1c7   : > { %v907_v35 = vpop.f32.mrf.mxu1 }
 0x1c8   : > { %v3271_v36 = vpack.c.bf16 %v916_v34, %v916_v34  ;;  %v908_v37 = vadd.f32 %v3092_v32, %v907_v35 }
 0x1c9   : > { %v3447_v38 = vpop.f32.mrf.mxu1 }
 0x1ca   : > { %941 = vst.msk [vmem:[#allocation2 + $0x8] sm:$0xf] %vm938_vm3, %v3271_v36  ;;  %v3269_v39 = vpack.c.bf16 %v908_v37, %v908_v37  ;;  %v919_v40 = vadd.f32 %v3447_v38, %v3092_v32 }
 0x1cb   : > { %v910_v41 = vpop.f32.mrf.mxu1 }
 0x1cc   : > { %939 = vst.msk [vmem:[#allocation2] sm:$0xf] %vm938_vm3, %v3269_v39  ;;  %v3272_v42 = vpack.c.bf16 %v919_v40, %v919_v40  ;;  %v911_v43 = vadd.f32 %v3092_v32, %v910_v41 }
 0x1ce   : > { %942 = vst.msk [vmem:[#allocation2 + $0xc] sm:$0xf] %vm938_vm3, %v3272_v42  ;;  %v3270_v44 = vpack.c.bf16 %v911_v43, %v911_v43 }
 0x1d0   : > { %940 = vst.msk [vmem:[#allocation2 + $0x4] sm:$0xf] %vm938_vm3, %v3270_v44 }
 0x1d1 PF: > { %v3734_v47 = vld [vmem:[%s4014_s3] sm:$0xff]   ;;  %vm1075_vm4 = vcmask 261120   ;;  %v3735_v48 = vld [vmem:[%s4014_s3 + $0x50] sm:$0xff]   ;;  %v3736_v49 = vld [vmem:[%s4014_s3 + $0x8] sm:$0xff]   ;;  %vm1710_vm5 = vcmask 523264   ;;  %p3235_p10 = scmp.ne.s32.totalorder %s3982_s27, 1 }
 0x1d2   : > { %3452 = vmatprep.mubr.msk.bf16.mxu0 %vm1075_vm4, %v3734_v47  ;;  %3472 = vmatprep.mubr.msk.bf16.mxu1 %vm1075_vm4, %v3735_v48  ;;  %v3737_v50 = vld [vmem:[%s4014_s3 + $0x58] sm:$0xff]   ;;  %v3738_v51 = vld [vmem:[%s4014_s3 + $0x10] sm:$0xff]   ;;  %v3739_v52 = vld [vmem:[%s4014_s3 + $0x60] sm:$0xff]   ;;  %s4577_s0 = sld [smem:[#allocation17_spill]] (!%p3235_p10) }
 0x1d3   : > { %v3740_v53 = vld [vmem:[%s4014_s3 + $0x18] sm:$0xff]   ;;  %v3741_v54 = vld [vmem:[%s4014_s3 + $0x68] sm:$0xff]   ;;  %v3742_v55 = vld [vmem:[%s4014_s3 + $0x20] sm:$0xff]  }
 0x1d4   : > { %v3743_v56 = vld [vmem:[%s4014_s3 + $0x70] sm:$0xff]   ;;  %v3744_v57 = vld [vmem:[%s4014_s3 + $0x28] sm:$0xff]   ;;  %v3745_v58 = vld [vmem:[%s4014_s3 + $0x78] sm:$0xff]  }
 0x1d5   : > { %v3732_v45 = vld [vmem:[#allocation2 + $0x8] sm:$0xff]   ;;  %v3746_v59 = vld [vmem:[%s4014_s3 + $0x30] sm:$0xff]   ;;  %v3747_v60 = vld [vmem:[%s4009_s24] sm:$0xff]  }
 0x1d6   : > { %3448 = vmatprep.subr.bf16.mxu0 %v3732_v45  ;;  %3688 = vmatprep.subr.bf16.mxu1 %v3732_v45  ;;  %v3748_v61 = vld [vmem:[%s4014_s3 + $0x38] sm:$0xff]   ;;  %v3749_v62 = vld [vmem:[%s4009_s24 + $0x8] sm:$0xff]   ;;  %v3750_v63 = vld [vmem:[%s4014_s3 + $0x40] sm:$0xff]  }
 0x1d7   : > { %v3733_v46 = vld [vmem:[#allocation2] sm:$0xff]   ;;  %3449 = vmatpush3.bf16.msra.mxu0 %v3732_v45  ;;  %3690 = vmatpush3.bf16.msra.mxu1 %v3732_v45  ;;  %v3751_v0 = vld [vmem:[%s4009_s24 + $0x10] sm:$0xff]   ;;  %v3766_v1 = vld [vmem:[%s4542_s8 + $0x18] sm:$0xff]  }
 0x1d8   : > { %3450 = vmatprep.subr.bf16.mxu0 %v3733_v46  ;;  %3689 = vmatprep.subr.bf16.mxu1 %v3733_v46  ;;  %v3767_v2 = vld [vmem:[%s4542_s8 + $0x10] sm:$0xff]   ;;  %v3752_v3 = vld [vmem:[%s4014_s3 + $0x48] sm:$0xff]   ;;  %v3753_v4 = vld [vmem:[%s4009_s24 + $0x18] sm:$0xff]  }
 0x1d9   : > { %v3754_v5 = vld [vmem:[%s4009_s24 + $0x20] sm:$0xff]   ;;  %v3755_v6 = vld [vmem:[%s4009_s24 + $0x28] sm:$0xff]   ;;  %v3756_v7 = vld [vmem:[%s4009_s24 + $0x30] sm:$0xff]  }
 0x1da   : > { %v3757_v8 = vld [vmem:[%s4009_s24 + $0x38] sm:$0xff]   ;;  %v3758_v9 = vld [vmem:[%s4009_s24 + $0x40] sm:$0xff]   ;;  %v3759_v10 = vld [vmem:[%s4009_s24 + $0x48] sm:$0xff]  }
 0x1db   : > { %3451 = vmatpush3.bf16.msra.mxu0 %v3733_v46  ;;  %3691 = vmatpush3.bf16.msra.mxu1 %v3733_v46  ;;  %v3760_v11 = vld [vmem:[%s4009_s24 + $0x50] sm:$0xff]   ;;  %v3761_v12 = vld [vmem:[%s4009_s24 + $0x58] sm:$0xff]   ;;  %v3762_v13 = vld [vmem:[%s4009_s24 + $0x60] sm:$0xff]  }
 0x1dc   : > { %3484 = vmatprep.subr.bf16.mxu1 %v3732_v45  ;;  %v3768_v14 = vld [vmem:[%s4542_s8 + $0x8] sm:$0xff]   ;;  %v3769_v16 = vld [vmem:[%s4542_s8] sm:$0xff]   ;;  %v3764_v17 = vld [vmem:[%s4009_s24 + $0x70] sm:$0xff]  }
 0x1dd   : > { %v3763_v15 = vld [vmem:[%s4009_s24 + $0x68] sm:$0xff]   ;;  %v3765_v18 = vld [vmem:[%s4009_s24 + $0x78] sm:$0xff]   ;;  %v3771_v20 = vld [vmem:[%s4543_s9 + $0x10] sm:$0xff]  }
 0x1de   : > { %3453 = vmatmul.mubr.msk.bf16.vlgmr.msra.gmra.mxu0 %vm1075_vm4, %v3736_v49  ;;  %3473 = vmatmul.mubr.msk.bf16.vlgmr.msra.gmra.mxu1 %vm1075_vm4, %v3737_v50  ;;  %v3770_v19 = vld [vmem:[%s4543_s9 + $0x18] sm:$0xff]   ;;  %v3772_v21 = vld [vmem:[%s4543_s9 + $0x8] sm:$0xff]   ;;  %v3773_v22 = vld [vmem:[%s4543_s9] sm:$0xff]  }
 0x1df   : > { %3456 = vmatprep.mubr.msk.bf16.mxu0 %vm1075_vm4, %v3738_v51  ;;  %3476 = vmatprep.mubr.msk.bf16.mxu1 %vm1075_vm4, %v3739_v52 }
 0x1e0   : > { %3485 = vmatpush3.bf16.msra.mxu1 %v3732_v45  ;;  %3520 = vmatprep.subr.bf16.mxu0 %v3770_v19 }
 0x1e1   : > { %3486 = vmatprep.subr.bf16.mxu1 %v3733_v46  ;;  %3521 = vmatpush3.bf16.msra.mxu0 %v3770_v19 }
 0x1e2   : > { %3522 = vmatprep.subr.bf16.mxu0 %v3771_v20 }
 0x1e4   : > { %3487 = vmatpush3.bf16.msra.mxu1 %v3733_v46 }
 0x1e5   : > { %3560 = vmatprep.subr.bf16.mxu1 %v3766_v1  ;;  %3523 = vmatpush3.bf16.msra.mxu0 %v3771_v20 }
 0x1e6   : > { %3457 = vmatmul.mubr.msk.bf16.gmra.mxu0 %vm1075_vm4, %v3740_v53  ;;  %3477 = vmatmul.mubr.msk.bf16.gmra.mxu1 %vm1075_vm4, %v3741_v54 }
 0x1e7   : > { %3460 = vmatprep.mubr.msk.bf16.mxu0 %vm1075_vm4, %v3742_v55  ;;  %3480 = vmatprep.mubr.msk.bf16.mxu1 %vm1075_vm4, %v3743_v56 }
 0x1e8   : > { %3524 = vmatprep.subr.bf16.mxu0 %v3772_v21 }
 0x1e9   : > { %3525 = vmatpush3.bf16.msra.mxu0 %v3772_v21 }
 0x1ea   : > { %3526 = vmatprep.subr.bf16.mxu0 %v3773_v22 }
 0x1ed   : > { %3527 = vmatpush3.bf16.msra.mxu0 %v3773_v22 }
 0x1ee   : > { %3461 = vmatmul.mubr.msk.bf16.gmra.mxu0 %vm1075_vm4, %v3744_v57  ;;  %3481 = vmatmul.mubr.msk.bf16.gmra.mxu1 %vm1075_vm4, %v3745_v58 }
 0x1ef   : > { %3464 = vmatprep.mubr.msk.bf16.mxu0 %vm1075_vm4, %v3746_v59  ;;  %3488 = vmatprep.mubr.msk.bf16.mxu1 %vm1075_vm4, %v3747_v60 }
 0x1f6   : > { %3465 = vmatmul.mubr.msk.bf16.gmra.mxu0 %vm1075_vm4, %v3748_v61  ;;  %3489 = vmatmul.mubr.msk.bf16.vlgmr.msra.gmra.mxu1 %vm1075_vm4, %v3749_v62 }
 0x1f7   : > { %3468 = vmatprep.mubr.msk.bf16.mxu0 %vm1075_vm4, %v3750_v63  ;;  %3492 = vmatprep.mubr.msk.bf16.mxu1 %vm1075_vm4, %v3751_v0 }
 0x1f8   : > { %3561 = vmatpush3.bf16.msra.mxu1 %v3766_v1 }
 0x1f9   : > { %3562 = vmatprep.subr.bf16.mxu1 %v3767_v2 }
 0x1fc   : > { %3563 = vmatpush3.bf16.msra.mxu1 %v3767_v2 }
 0x1fd   : > { %3564 = vmatprep.subr.bf16.mxu1 %v3768_v14 }
 0x1fe   : > { %3469 = vmatmul.mubr.msk.bf16.gmra.mxu0 %vm1075_vm4, %v3752_v3  ;;  %3493 = vmatmul.mubr.msk.bf16.gmra.mxu1 %vm1075_vm4, %v3753_v4 }
 0x1ff   : > { %3496 = vmatprep.mubr.msk.bf16.mxu1 %vm1075_vm4, %v3754_v5 }
 0x200   : > { %3565 = vmatpush3.bf16.msra.mxu1 %v3768_v14 }
 0x201   : > { %3566 = vmatprep.subr.bf16.mxu1 %v3769_v16 }
 0x204   : > { %3567 = vmatpush3.bf16.msra.mxu1 %v3769_v16 }
 0x206   : > { %3497 = vmatmul.mubr.msk.bf16.gmra.mxu1 %vm1075_vm4, %v3755_v6 }
 0x207   : > { %3500 = vmatprep.mubr.msk.bf16.mxu1 %vm1075_vm4, %v3756_v7 }
 0x20e   : > { %3501 = vmatmul.mubr.msk.bf16.gmra.mxu1 %vm1075_vm4, %v3757_v8 }
 0x20f   : > { %3504 = vmatprep.mubr.msk.bf16.mxu1 %vm1075_vm4, %v3758_v9 }
 0x216   : > { %3505 = vmatmul.mubr.msk.bf16.gmra.mxu1 %vm1075_vm4, %v3759_v10 }
 0x217   : > { %3508 = vmatprep.mubr.msk.bf16.mxu1 %vm1075_vm4, %v3760_v11 }
 0x21e   : > { %3509 = vmatmul.mubr.msk.bf16.gmra.mxu1 %vm1075_vm4, %v3761_v12 }
 0x21f   : > { %3512 = vmatprep.mubr.msk.bf16.mxu1 %vm1075_vm4, %v3762_v13 }
 0x226   : > { %3513 = vmatmul.mubr.msk.bf16.gmra.mxu1 %vm1075_vm4, %v3763_v15 }
 0x227   : > { %3516 = vmatprep.mubr.msk.bf16.mxu1 %vm1075_vm4, %v3764_v17 }
 0x22e   : > { %3517 = vmatmul.mubr.msk.bf16.gmra.mxu1 %vm1075_vm4, %v3765_v18 }
 0x29e   : > { %v3454_v23 = vpop.f32.mrf.mxu0  ;;  %v4146_v24 = vpop.f32.mrf.mxu1 }
 0x2a0   : > { %v1158_v25 = vpop.f32.mrf.mxu0  ;;  %v4148_v26 = vpop.f32.mrf.mxu1 }
 0x2a2   : > { %v3455_v27 = vpop.f32.mrf.mxu0  ;;  %v4150_v28 = vpop.f32.mrf.mxu1 }
 0x2a3   : > { %v1607_v29 = vpack.c.bf16 %v3455_v27, %v3454_v23 }
 0x2a4   : > { %v1161_v30 = vpop.f32.mrf.mxu0  ;;  %v4152_v31 = vpop.f32.mrf.mxu1 }
 0x2a5   : > { %v1606_v32 = vpack.c.bf16 %v1161_v30, %v1158_v25  ;;  %v1616_v20 = vpack.c.bf16 %v4152_v31, %v4148_v26 }
 0x2a6   : > { %v4154_v33 = vpop.f32.mrf.mxu0  ;;  %v4156_v34 = vpop.f32.mrf.mxu1 }
 0x2a7   : > { %3568 = vmatprep.mubr.msk.bf16.mxu1 %vm1710_vm5, %v1606_v32 }
 0x2a8   : > { %v1174_v35 = vpop.f32.mrf.mxu0  ;;  %v4159_v36 = vpop.f32.mrf.mxu1  ;;  %3569 = vmatmul.mubr.msk.bf16.vlgmr.msra.gmra.mxu1 %vm1710_vm5, %v1607_v29 }
 0x2aa   : > { %v3459_v37 = vpop.f32.mrf.mxu0  ;;  %v4162_v38 = vpop.f32.mrf.mxu1 }
 0x2ab   : > { %v1609_v39 = vpack.c.bf16 %v3459_v37, %v4154_v33 }
 0x2ac   : > { %v1177_v40 = vpop.f32.mrf.mxu0  ;;  %v4165_v41 = vpop.f32.mrf.mxu1 }
 0x2ad   : > { %v1608_v42 = vpack.c.bf16 %v1177_v40, %v1174_v35 }
 0x2ae   : > { %v4167_v43 = vpop.f32.mrf.mxu0  ;;  %v4169_v44 = vpop.f32.mrf.mxu1 }
 0x2af   : > { %3572 = vmatprep.mubr.msk.bf16.mxu1 %vm1710_vm5, %v1608_v42 }
 0x2b0   : > { %v4172_v45 = vpop.f32.mrf.mxu0  ;;  %v4174_v46 = vpop.f32.mrf.mxu1  ;;  %3573 = vmatmul.mubr.msk.bf16.gmra.mxu1 %vm1710_vm5, %v1609_v39  ;;  %v1618_v39 = vpack.c.bf16 %v4165_v41, %v4159_v36 }
 0x2b2   : > { %v4177_v47 = vpop.f32.mrf.mxu0  ;;  %v4179_v48 = vpop.f32.mrf.mxu1 }
 0x2b3   : > { %v1611_v49 = vpack.c.bf16 %v4177_v47, %v4167_v43 }
 0x2b4   : > { %v1193_v50 = vpop.f32.mrf.mxu0  ;;  %v4183_v51 = vpop.f32.mrf.mxu1 }
 0x2b5   : > { %v1610_v52 = vpack.c.bf16 %v1193_v50, %v4172_v45 }
 0x2b6   : > { %v4186_v53 = vpop.f32.mrf.mxu0  ;;  %v3490_v54 = vpop.f32.mrf.mxu1 }
 0x2b7   : > { %3576 = vmatprep.mubr.msk.bf16.mxu1 %vm1710_vm5, %v1610_v52  ;;  %v1632_v2 = vsub.f32 %v3490_v54, %v3454_v23  ;;  %v1619_v54 = vpack.c.bf16 %v4162_v38, %v4156_v34 }
 0x2b8   : > { %v4189_v55 = vpop.f32.mrf.mxu0  ;;  %v1479_v56 = vpop.f32.mrf.mxu1  ;;  %3577 = vmatmul.mubr.msk.bf16.gmra.mxu1 %vm1710_vm5, %v1611_v49 }
 0x2b9   : > { %v1630_v63 = vsub.f32 %v1479_v56, %v1158_v25 }
 0x2ba   : > { %v4192_v57 = vpop.f32.mrf.mxu0  ;;  %v3491_v58 = vpop.f32.mrf.mxu1 }
 0x2bb   : > { %v1613_v59 = vpack.c.bf16 %v4192_v57, %v4186_v53  ;;  %v1633_v60 = vsub.f32 %v3491_v58, %v3455_v27 }
 0x2bc   : > { %v1209_v61 = vpop.f32.mrf.mxu0  ;;  %v1482_v62 = vpop.f32.mrf.mxu1 }
 0x2bd   : > { %v1612_v0 = vpack.c.bf16 %v1209_v61, %v4189_v55  ;;  %v1631_v1 = vsub.f32 %v1482_v62, %v1161_v30  ;;  %v1663_v6 = vpack.c.bf16 %v1633_v60, %v1632_v2 }
 0x2be   : > { %v4197_v3 = vpop.f32.mrf.mxu0  ;;  %v3494_v4 = vpop.f32.mrf.mxu1 }
 0x2bf   : > { %v1662_v5 = vpack.c.bf16 %v1631_v1, %v1630_v63  ;;  %3580 = vmatprep.mubr.msk.bf16.mxu1 %vm1710_vm5, %v1612_v0  ;;  %v1636_v18 = vsub.f32 %v3494_v4, %v4154_v33  ;;  %v1617_v33 = vpack.c.bf16 %v4150_v28, %v4146_v24  ;;  %v1621_v1 = vpack.c.bf16 %v4179_v48, %v4169_v44 }
 0x2c0   : > { %v4200_v7 = vpop.f32.mrf.mxu0  ;;  %v1495_v8 = vpop.f32.mrf.mxu1  ;;  %3581 = vmatmul.mubr.msk.bf16.gmra.mxu1 %vm1710_vm5, %v1613_v59  ;;  %v1620_v59 = vpack.c.bf16 %v4183_v51, %v4174_v46 }
 0x2c1   : > { %3528 = vmatprep.mubr.msk.bf16.mxu0 %vm1710_vm5, %v1662_v5  ;;  %v1634_v15 = vsub.f32 %v1495_v8, %v1174_v35 }
 0x2c2   : > { %v4204_v9 = vpop.f32.mrf.mxu0  ;;  %v3495_v10 = vpop.f32.mrf.mxu1  ;;  %3529 = vmatmul.mubr.msk.bf16.vlgmr.msra.gmra.mxu0 %vm1710_vm5, %v1663_v6 }
 0x2c3   : > { %v1615_v11 = vpack.c.bf16 %v4204_v9, %v4197_v3  ;;  %v1637_v12 = vsub.f32 %v3495_v10, %v3459_v37 }
 0x2c4   : > { %v1225_v13 = vpop.f32.mrf.mxu0  ;;  %v1498_v14 = vpop.f32.mrf.mxu1 }
 0x2c5   : > { %v1614_v16 = vpack.c.bf16 %v1225_v13, %v4200_v7  ;;  %v1635_v17 = vsub.f32 %v1498_v14, %v1177_v40  ;;  %v1665_v22 = vpack.c.bf16 %v1637_v12, %v1636_v18 }
 0x2c6   : > { %v3498_v19 = vpop.f32.mrf.mxu1 }
 0x2c7   : > { %v1664_v21 = vpack.c.bf16 %v1635_v17, %v1634_v15  ;;  %3584 = vmatprep.mubr.msk.bf16.mxu1 %vm1710_vm5, %v1614_v16  ;;  %v1640_v35 = vsub.f32 %v3498_v19, %v4167_v43 }
 0x2c8   : > { %v1511_v23 = vpop.f32.mrf.mxu1  ;;  %3585 = vmatmul.mubr.msk.bf16.gmra.mxu1 %vm1710_vm5, %v1615_v11 }
 0x2c9   : > { %3532 = vmatprep.mubr.msk.bf16.mxu0 %vm1710_vm5, %v1664_v21  ;;  %3588 = vmatprep.mubr.msk.bf16.mxu1 %vm1710_vm5, %v1616_v20  ;;  %v1638_v30 = vsub.f32 %v1511_v23, %v4172_v45 }
 0x2ca   : > { %v3499_v25 = vpop.f32.mrf.mxu1  ;;  %3533 = vmatmul.mubr.msk.bf16.gmra.mxu0 %vm1710_vm5, %v1665_v22 }
 0x2cb   : > { %v1641_v27 = vsub.f32 %v3499_v25, %v4177_v47 }
 0x2cc   : > { %v1514_v29 = vpop.f32.mrf.mxu1 }
 0x2cd   : > { %v1639_v32 = vsub.f32 %v1514_v29, %v1193_v50  ;;  %v1667_v42 = vpack.c.bf16 %v1641_v27, %v1640_v35 }
 0x2ce   : > { %v3502_v37 = vpop.f32.mrf.mxu1 }
 0x2cf   : > { %v1666_v40 = vpack.c.bf16 %v1639_v32, %v1638_v30  ;;  %v1644_v56 = vsub.f32 %v3502_v37, %v4186_v53  ;;  %v3775_v32 = vld [vmem:[%s4545_s11 + $0x10] sm:$0xff]  }
 0x2d0   : > { %v1527_v49 = vpop.f32.mrf.mxu1  ;;  %3589 = vmatmul.mubr.msk.bf16.gmra.mxu1 %vm1710_vm5, %v1617_v33 }
 0x2d1   : > { %3536 = vmatprep.mubr.msk.bf16.mxu0 %vm1710_vm5, %v1666_v40  ;;  %3592 = vmatprep.mubr.msk.bf16.mxu1 %vm1710_vm5, %v1618_v39  ;;  %v1642_v43 = vsub.f32 %v1527_v49, %v4189_v55 }
 0x2d2   : > { %v3503_v45 = vpop.f32.mrf.mxu1  ;;  %3537 = vmatmul.mubr.msk.bf16.gmra.mxu0 %vm1710_vm5, %v1667_v42 }
 0x2d3   : > { %v1645_v47 = vsub.f32 %v3503_v45, %v4192_v57 }
 0x2d4   : > { %v1530_v50 = vpop.f32.mrf.mxu1 }
 0x2d5   : > { %v1643_v52 = vsub.f32 %v1530_v50, %v1209_v61  ;;  %v1669_v62 = vpack.c.bf16 %v1645_v47, %v1644_v56 }
 0x2d6   : > { %v3506_v58 = vpop.f32.mrf.mxu1 }
 0x2d7   : > { %v1668_v60 = vpack.c.bf16 %v1643_v52, %v1642_v43  ;;  %v1648_v2 = vsub.f32 %v3506_v58, %v4197_v3 }
 0x2d8   : > { %v1543_v63 = vpop.f32.mrf.mxu1  ;;  %3593 = vmatmul.mubr.msk.bf16.gmra.mxu1 %vm1710_vm5, %v1619_v54 }
 0x2d9   : > { %3540 = vmatprep.mubr.msk.bf16.mxu0 %vm1710_vm5, %v1668_v60  ;;  %3596 = vmatprep.mubr.msk.bf16.mxu1 %vm1710_vm5, %v1620_v59  ;;  %v1646_v53 = vsub.f32 %v1543_v63, %v4200_v7 }
 0x2da   : > { %v3507_v55 = vpop.f32.mrf.mxu1  ;;  %3541 = vmatmul.mubr.msk.bf16.gmra.mxu0 %vm1710_vm5, %v1669_v62 }
 0x2db   : > { %v1649_v57 = vsub.f32 %v3507_v55, %v4204_v9  ;;  %v4289_v55 = vld [vmem:[%s4544_s10] ss:$0 sm:$0xff] }
 0x2dc   : > { %v1546_v61 = vpop.f32.mrf.mxu1 }
 0x2dd   : > { %v1647_v0 = vsub.f32 %v1546_v61, %v1225_v13  ;;  %v1671_v6 = vpack.c.bf16 %v1649_v57, %v1648_v2 }
 0x2de   : > { %v3510_v4 = vpop.f32.mrf.mxu1 }
 0x2df   : > { %v1670_v5 = vpack.c.bf16 %v1647_v0, %v1646_v53  ;;  %v1652_v9 = vsub.f32 %v3510_v4, %v4146_v24 }
 0x2e0   : > { %v1559_v8 = vpop.f32.mrf.mxu1  ;;  %3597 = vmatmul.mubr.msk.bf16.gmra.mxu1 %vm1710_vm5, %v1621_v1 }
 0x2e1   : > { %3544 = vmatprep.mubr.msk.bf16.mxu0 %vm1710_vm5, %v1670_v5  ;;  %v1650_v12 = vsub.f32 %v1559_v8, %v4148_v26 }
 0x2e2   : > { %v3511_v10 = vpop.f32.mrf.mxu1  ;;  %3545 = vmatmul.mubr.msk.bf16.gmra.mxu0 %vm1710_vm5, %v1671_v6 }
 0x2e3   : > { %v1653_v7 = vsub.f32 %v3511_v10, %v4150_v28 }
 0x2e4   : > { %v1562_v11 = vpop.f32.mrf.mxu1 }
 0x2e5   : > { %v1673_v13 = vpack.c.bf16 %v1653_v7, %v1652_v9  ;;  %v1651_v3 = vsub.f32 %v1562_v11, %v4152_v31 }
 0x2e6   : > { %v3514_v14 = vpop.f32.mrf.mxu1 }
 0x2e7   : > { %v1672_v15 = vpack.c.bf16 %v1651_v3, %v1650_v12  ;;  %v1656_v18 = vsub.f32 %v3514_v14, %v4156_v34  ;;  %v3774_v34 = vld [vmem:[%s4545_s11 + $0x18] sm:$0xff]  }
 0x2e8   : > { %v1575_v16 = vpop.f32.mrf.mxu1  ;;  %3600 = vmatprep.subr.bf16.mxu0 %v3774_v34 }
 0x2e9   : > { %3548 = vmatprep.mubr.msk.bf16.mxu0 %vm1710_vm5, %v1672_v15  ;;  %v1654_v28 = vsub.f32 %v1575_v16, %v4159_v36  ;;  %3601 = vmatpush3.bf16.msra.mxu0 %v3774_v34 }
 0x2ea   : > { %v3515_v17 = vpop.f32.mrf.mxu1  ;;  %3549 = vmatmul.mubr.msk.bf16.gmra.mxu0 %vm1710_vm5, %v1673_v13  ;;  %3602 = vmatprep.subr.bf16.mxu0 %v3775_v32 }
 0x2eb   : > { %v1657_v24 = vsub.f32 %v3515_v17, %v4162_v38 }
 0x2ec   : > { %v1578_v19 = vpop.f32.mrf.mxu1 }
 0x2ed   : > { %v1675_v20 = vpack.c.bf16 %v1657_v24, %v1656_v18  ;;  %v1655_v26 = vsub.f32 %v1578_v19, %v4165_v41  ;;  %3603 = vmatpush3.bf16.msra.mxu0 %v3775_v32 }
 0x2ee   : > { %v3518_v21 = vpop.f32.mrf.mxu1 }
 0x2ef   : > { %v1674_v31 = vpack.c.bf16 %v1655_v26, %v1654_v28  ;;  %v1660_v38 = vsub.f32 %v3518_v21, %v4169_v44  ;;  %v3776_v44 = vld [vmem:[%s4545_s11 + $0x8] sm:$0xff]  }
 0x2f0   : > { %v1591_v22 = vpop.f32.mrf.mxu1  ;;  %3604 = vmatprep.subr.bf16.mxu0 %v3776_v44 }
 0x2f1   : > { %3552 = vmatprep.mubr.msk.bf16.mxu0 %vm1710_vm5, %v1674_v31  ;;  %v1658_v41 = vsub.f32 %v1591_v22, %v4174_v46  ;;  %3605 = vmatpush3.bf16.msra.mxu0 %v3776_v44  ;;  %v3777_v46 = vld [vmem:[%s4545_s11] sm:$0xff]  }
 0x2f2   : > { %v3519_v23 = vpop.f32.mrf.mxu1  ;;  %3553 = vmatmul.mubr.msk.bf16.gmra.mxu0 %vm1710_vm5, %v1675_v20  ;;  %3606 = vmatprep.subr.bf16.mxu0 %v3777_v46 }
 0x2f3   : > { %v1661_v25 = vsub.f32 %v3519_v23, %v4179_v48 }
 0x2f4   : > { %v1594_v36 = vpop.f32.mrf.mxu1 }
 0x2f5   : > { %v1677_v27 = vpack.c.bf16 %v1661_v25, %v1660_v38  ;;  %v1659_v29 = vsub.f32 %v1594_v36, %v4183_v51  ;;  %3607 = vmatpush3.bf16.msra.mxu0 %v3777_v46 }
 0x2f7   : > { %v1676_v30 = vpack.c.bf16 %v1659_v29, %v1658_v41 }
 0x2f9   : > { %3556 = vmatprep.mubr.msk.bf16.mxu0 %vm1710_vm5, %v1676_v30 }
 0x2fa   : > { %3557 = vmatmul.mubr.msk.bf16.gmra.mxu0 %vm1710_vm5, %v1677_v27 }
 0x368   : > { %v3570_v48 = vpop.f32.mrf.mxu1 }
 0x36a   : > { %v2026_v51 = vpop.f32.mrf.mxu1 }
 0x36c   : > { %v3571_v33 = vpop.f32.mrf.mxu1 }
 0x36e   : > { %v2029_v35 = vpop.f32.mrf.mxu1 }
 0x370   : > { %v3574_v37 = vpop.f32.mrf.mxu1 }
 0x372   : > { %v2042_v39 = vpop.f32.mrf.mxu1 }
 0x374   : > { %v3575_v40 = vpop.f32.mrf.mxu1 }
 0x376   : > { %v2045_v42 = vpop.f32.mrf.mxu1 }
 0x378   : > { %v3578_v49 = vpop.f32.mrf.mxu1 }
 0x37a   : > { %v2058_v45 = vpop.f32.mrf.mxu1 }
 0x37c   : > { %v3579_v47 = vpop.f32.mrf.mxu1 }
 0x37e   : > { %v2061_v50 = vpop.f32.mrf.mxu1 }
 0x380   : > { %v4278_v43 = vpop.f32.mrf.mxu1 }
 0x382   : > { %v3530_v52 = vpop.f32.mrf.mxu0  ;;  %v4280_v54 = vpop.f32.mrf.mxu1 }
 0x383   : > { %v2035_v60 = vadd.f32 %v3570_v48, %v3530_v52 }
 0x384   : > { %v1793_v56 = vpop.f32.mrf.mxu0  ;;  %v4282_v58 = vpop.f32.mrf.mxu1 }
 0x385   : > { %v2027_v59 = vadd.f32 %v2026_v51, %v1793_v56  ;;  %v2162_v4 = vadd.f32 %v4289_v55, %v2035_v60 }
 0x386   : > { %v3531_v62 = vpop.f32.mrf.mxu0  ;;  %v4284_v63 = vpop.f32.mrf.mxu1 }
 0x387   : > { %v2038_v57 = vadd.f32 %v3571_v33, %v3531_v62  ;;  %v2160_v0 = vadd.f32 %v4289_v55, %v2027_v59  ;;  %v2194_v3 = vmax.f32 %v2162_v4, 0.0 }
 0x388   : > { %v1796_v61 = vpop.f32.mrf.mxu0  ;;  %v4291_v53 = vpop.f32.mrf.mxu1 }
 0x389   : > { %v2163_v1 = vadd.f32 %v4289_v55, %v2038_v57  ;;  %v2030_v2 = vadd.f32 %v2029_v35, %v1796_v61  ;;  %v2192_v11 = vmax.f32 %v2160_v0, 0.0 }
 0x38a   : > { %v3534_v5 = vpop.f32.mrf.mxu0  ;;  %v4296_v6 = vpop.f32.mrf.mxu1 }
 0x38b   : > { %v2161_v8 = vadd.f32 %v4289_v55, %v2030_v2  ;;  %v2195_v10 = vmax.f32 %v2163_v1, 0.0  ;;  %v2051_v14 = vadd.f32 %v3574_v37, %v3534_v5 }
 0x38c   : > { %v1809_v9 = vpop.f32.mrf.mxu0  ;;  %v4299_v7 = vpop.f32.mrf.mxu1 }
 0x38d   : > { %v2193_v12 = vmax.f32 %v2161_v8, 0.0  ;;  %v2043_v13 = vadd.f32 %v2042_v39, %v1809_v9  ;;  %v2225_v18 = vpack.c.bf16 %v2195_v10, %v2194_v3  ;;  %v2166_v21 = vadd.f32 %v4289_v55, %v2051_v14 }
 0x38e   : > { %v3535_v15 = vpop.f32.mrf.mxu0  ;;  %v4301_v24 = vpop.f32.mrf.mxu1 }
 0x38f   : > { %v2224_v16 = vpack.c.bf16 %v2193_v12, %v2192_v11  ;;  %v2054_v17 = vadd.f32 %v3575_v40, %v3535_v15  ;;  %v2164_v28 = vadd.f32 %v4289_v55, %v2043_v13  ;;  %v2198_v27 = vmax.f32 %v2166_v21, 0.0 }
 0x390   : > { %v1812_v19 = vpop.f32.mrf.mxu0  ;;  %v4309_v34 = vpop.f32.mrf.mxu1 }
 0x391   : > { %v2167_v20 = vadd.f32 %v4289_v55, %v2054_v17  ;;  %v2046_v26 = vadd.f32 %v2045_v42, %v1812_v19  ;;  %3608 = vmatprep.mubr.msk.bf16.mxu0 %vm1710_vm5, %v2224_v16  ;;  %v2196_v25 = vmax.f32 %v2164_v28, 0.0 }
 0x392   : > { %v3538_v31 = vpop.f32.mrf.mxu0  ;;  %3609 = vmatmul.mubr.msk.bf16.vlgmr.msra.gmra.mxu0 %vm1710_vm5, %v2225_v18  ;;  %v2106_v48 = vpop.f32.mrf.mxu1 }
 0x393   : > { %v2165_v22 = vadd.f32 %v4289_v55, %v2046_v26  ;;  %v2199_v23 = vmax.f32 %v2167_v20, 0.0  ;;  %v2067_v29 = vadd.f32 %v3578_v49, %v3538_v31 }
 0x394   : > { %v1825_v38 = vpop.f32.mrf.mxu0  ;;  %v3591_v49 = vpop.f32.mrf.mxu1 }
 0x395   : > { %v2197_v36 = vmax.f32 %v2165_v22, 0.0  ;;  %v2059_v41 = vadd.f32 %v2058_v45, %v1825_v38  ;;  %v2227_v46 = vpack.c.bf16 %v2199_v23, %v2198_v27  ;;  %v2170_v39 = vadd.f32 %v4289_v55, %v2067_v29 }
 0x396   : > { %v3539_v30 = vpop.f32.mrf.mxu0  ;;  %v2109_v1 = vpop.f32.mrf.mxu1 }
 0x397   : > { %v2226_v32 = vpack.c.bf16 %v2197_v36, %v2196_v25  ;;  %v2070_v44 = vadd.f32 %v3579_v47, %v3539_v30  ;;  %v2168_v33 = vadd.f32 %v4289_v55, %v2059_v41  ;;  %v2202_v60 = vmax.f32 %v2170_v39, 0.0 }
 0x398   : > { %v1828_v51 = vpop.f32.mrf.mxu0  ;;  %v3594_v9 = vpop.f32.mrf.mxu1 }
 0x399   : > { %v2171_v35 = vadd.f32 %v4289_v55, %v2070_v44  ;;  %v2062_v37 = vadd.f32 %v2061_v50, %v1828_v51  ;;  %3612 = vmatprep.mubr.msk.bf16.mxu0 %vm1710_vm5, %v2226_v32  ;;  %v2200_v52 = vmax.f32 %v2168_v33, 0.0 }
 0x39a   : > { %v3542_v40 = vpop.f32.mrf.mxu0  ;;  %3613 = vmatmul.mubr.msk.bf16.gmra.mxu0 %vm1710_vm5, %v2227_v46  ;;  %v2122_v18 = vpop.f32.mrf.mxu1 }
 0x39b   : > { %v2169_v42 = vadd.f32 %v4289_v55, %v2062_v37  ;;  %v2203_v45 = vmax.f32 %v2171_v35, 0.0  ;;  %v2083_v62 = vadd.f32 %v4278_v43, %v3542_v40 }
 0x39c   : > { %v1841_v47 = vpop.f32.mrf.mxu0  ;;  %v3595_v22 = vpop.f32.mrf.mxu1 }
 0x39d   : > { %v2201_v56 = vmax.f32 %v2169_v42, 0.0  ;;  %v2075_v59 = vadd.f32 %v4280_v54, %v1841_v47  ;;  %v2229_v0 = vpack.c.bf16 %v2203_v45, %v2202_v60  ;;  %v2174_v54 = vadd.f32 %v4289_v55, %v2083_v62 }
 0x39e   : > { %v3543_v50 = vpop.f32.mrf.mxu0  ;;  %v2125_v32 = vpop.f32.mrf.mxu1 }
 0x39f   : > { %v2228_v57 = vpack.c.bf16 %v2201_v56, %v2200_v52  ;;  %v2086_v61 = vadd.f32 %v4282_v58, %v3543_v50  ;;  %v2172_v4 = vadd.f32 %v4289_v55, %v2075_v59  ;;  %v2206_v14 = vmax.f32 %v2174_v54, 0.0 }
 0x3a0   : > { %v1844_v2 = vpop.f32.mrf.mxu0 }
 0x3a1   : > { %v2175_v5 = vadd.f32 %v4289_v55, %v2086_v61  ;;  %v2078_v8 = vadd.f32 %v4284_v63, %v1844_v2  ;;  %3616 = vmatprep.mubr.msk.bf16.mxu0 %vm1710_vm5, %v2228_v57  ;;  %v2204_v12 = vmax.f32 %v2172_v4, 0.0 }
 0x3a2   : > { %v3546_v10 = vpop.f32.mrf.mxu0  ;;  %3617 = vmatmul.mubr.msk.bf16.gmra.mxu0 %vm1710_vm5, %v2229_v0 }
 0x3a3   : > { %v2173_v43 = vadd.f32 %v4289_v55, %v2078_v8  ;;  %v2207_v58 = vmax.f32 %v2175_v5, 0.0  ;;  %v2099_v15 = vadd.f32 %v4291_v53, %v3546_v10 }
 0x3a4   : > { %v1857_v11 = vpop.f32.mrf.mxu0 }
 0x3a5   : > { %v2205_v13 = vmax.f32 %v2173_v43, 0.0  ;;  %v2091_v3 = vadd.f32 %v4296_v6, %v1857_v11  ;;  %v2231_v19 = vpack.c.bf16 %v2207_v58, %v2206_v14  ;;  %v2178_v6 = vadd.f32 %v4289_v55, %v2099_v15 }
 0x3a6   : > { %v3547_v63 = vpop.f32.mrf.mxu0 }
 0x3a7   : > { %v2230_v16 = vpack.c.bf16 %v2205_v13, %v2204_v12  ;;  %v2102_v17 = vadd.f32 %v4299_v7, %v3547_v63  ;;  %v2176_v20 = vadd.f32 %v4289_v55, %v2091_v3  ;;  %v2210_v41 = vmax.f32 %v2178_v6, 0.0 }
 0x3a8   : > { %v1860_v28 = vpop.f32.mrf.mxu0 }
 0x3a9   : > { %v2179_v26 = vadd.f32 %v4289_v55, %v2102_v17  ;;  %v2094_v21 = vadd.f32 %v4301_v24, %v1860_v28  ;;  %3620 = vmatprep.mubr.msk.bf16.mxu0 %vm1710_vm5, %v2230_v16  ;;  %v2208_v38 = vmax.f32 %v2176_v20, 0.0 }
 0x3aa   : > { %v3550_v31 = vpop.f32.mrf.mxu0  ;;  %3621 = vmatmul.mubr.msk.bf16.gmra.mxu0 %vm1710_vm5, %v2231_v19 }
 0x3ab   : > { %v2177_v53 = vadd.f32 %v4289_v55, %v2094_v21  ;;  %v2211_v7 = vmax.f32 %v2179_v26, 0.0  ;;  %v2115_v27 = vadd.f32 %v4309_v34, %v3550_v31 }
 0x3ac   : > { %v1873_v23 = vpop.f32.mrf.mxu0 }
 0x3ad   : > { %v2209_v25 = vmax.f32 %v2177_v53, 0.0  ;;  %v2107_v36 = vadd.f32 %v2106_v48, %v1873_v23  ;;  %v2233_v44 = vpack.c.bf16 %v2211_v7, %v2210_v41  ;;  %v2182_v37 = vadd.f32 %v4289_v55, %v2115_v27  ;;  %v3598_v48 = vpop.f32.mrf.mxu1  ;;  %v3780_v23 = vld [vmem:[%s4016_s26 + $0x4] ss:$8 sps:$4 sm:$0xff]  }
 0x3ae   : > { %v3551_v29 = vpop.f32.mrf.mxu0  ;;  %2564 = vmatprep.mubr.bf16.mxu1 %v3780_v23 }
 0x3af   : > { %v2232_v24 = vpack.c.bf16 %v2209_v25, %v2208_v38  ;;  %v2118_v30 = vadd.f32 %v3591_v49, %v3551_v29  ;;  %v2180_v51 = vadd.f32 %v4289_v55, %v2107_v36  ;;  %v2214_v52 = vmax.f32 %v2182_v37, 0.0  ;;  %v2138_v50 = vpop.f32.mrf.mxu1  ;;  %v4362_v25 = vld [vmem:[%s4546_s12] ss:$0 sm:$0xff] }
 0x3b0   : > { %v1876_v46 = vpop.f32.mrf.mxu0 }
 0x3b1   : > { %v2183_v33 = vadd.f32 %v4289_v55, %v2118_v30  ;;  %v2110_v35 = vadd.f32 %v2109_v1, %v1876_v46  ;;  %3624 = vmatprep.mubr.msk.bf16.mxu0 %vm1710_vm5, %v2232_v24  ;;  %v2212_v49 = vmax.f32 %v2180_v51, 0.0  ;;  %v3599_v54 = vpop.f32.mrf.mxu1 }
 0x3b2   : > { %v3554_v39 = vpop.f32.mrf.mxu0  ;;  %3625 = vmatmul.mubr.msk.bf16.gmra.mxu0 %vm1710_vm5, %v2233_v44 }
 0x3b3   : > { %v2181_v34 = vadd.f32 %v4289_v55, %v2110_v35  ;;  %v2215_v40 = vmax.f32 %v2183_v33, 0.0  ;;  %v2131_v56 = vadd.f32 %v3594_v9, %v3554_v39  ;;  %v2141_v63 = vpop.f32.mrf.mxu1 }
 0x3b4   : > { %v1889_v42 = vpop.f32.mrf.mxu0 }
 0x3b5   : > { %v2213_v45 = vmax.f32 %v2181_v34, 0.0  ;;  %v2123_v47 = vadd.f32 %v2122_v18, %v1889_v42  ;;  %v2235_v57 = vpack.c.bf16 %v2215_v40, %v2214_v52  ;;  %v2186_v4 = vadd.f32 %v4289_v55, %v2131_v56 }
 0x3b6   : > { %v3555_v59 = vpop.f32.mrf.mxu0 }
 0x3b7   : > { %v2234_v60 = vpack.c.bf16 %v2213_v45, %v2212_v49  ;;  %v2134_v62 = vadd.f32 %v3595_v22, %v3555_v59  ;;  %v2184_v0 = vadd.f32 %v4289_v55, %v2123_v47  ;;  %v2218_v12 = vmax.f32 %v2186_v4, 0.0 }
 0x3b8   : > { %v1892_v61 = vpop.f32.mrf.mxu0 }
 0x3b9   : > { %v2187_v1 = vadd.f32 %v4289_v55, %v2134_v62  ;;  %v2126_v2 = vadd.f32 %v2125_v32, %v1892_v61  ;;  %3628 = vmatprep.mubr.msk.bf16.mxu0 %vm1710_vm5, %v2234_v60  ;;  %v2216_v9 = vmax.f32 %v2184_v0, 0.0 }
 0x3ba   : > { %v3558_v5 = vpop.f32.mrf.mxu0  ;;  %3629 = vmatmul.mubr.msk.bf16.gmra.mxu0 %vm1710_vm5, %v2235_v57 }
 0x3bb   : > { %v2185_v8 = vadd.f32 %v4289_v55, %v2126_v2  ;;  %v2219_v10 = vmax.f32 %v2187_v1, 0.0  ;;  %v2147_v13 = vadd.f32 %v3598_v48, %v3558_v5 }
 0x3bc   : > { %v1905_v43 = vpop.f32.mrf.mxu0 }
 0x3bd   : > { %v2217_v58 = vmax.f32 %v2185_v8, 0.0  ;;  %v2139_v11 = vadd.f32 %v2138_v50, %v1905_v43  ;;  %v2237_v16 = vpack.c.bf16 %v2219_v10, %v2218_v12  ;;  %v2190_v20 = vadd.f32 %v4289_v55, %v2147_v13 }
 0x3be   : > { %v3559_v3 = vpop.f32.mrf.mxu0 }
 0x3bf   : > { %v2236_v14 = vpack.c.bf16 %v2217_v58, %v2216_v9  ;;  %v2150_v15 = vadd.f32 %v3599_v54, %v3559_v3  ;;  %v2188_v18 = vadd.f32 %v4289_v55, %v2139_v11  ;;  %v2222_v53 = vmax.f32 %v2190_v20, 0.0 }
 0x3c0   : > { %v1908_v17 = vpop.f32.mrf.mxu0 }
 0x3c1   : > { %v2191_v19 = vadd.f32 %v4289_v55, %v2150_v15  ;;  %v2142_v28 = vadd.f32 %v2141_v63, %v1908_v17  ;;  %3632 = vmatprep.mubr.msk.bf16.mxu0 %vm1710_vm5, %v2236_v14  ;;  %v2220_v6 = vmax.f32 %v2188_v18, 0.0 }
 0x3c2   : > { %3633 = vmatmul.mubr.msk.bf16.gmra.mxu0 %vm1710_vm5, %v2237_v16 }
 0x3c3   : > { %v2189_v26 = vadd.f32 %v4289_v55, %v2142_v28  ;;  %v2223_v21 = vmax.f32 %v2191_v19, 0.0 }
 0x3c5   : > { %v2221_v31 = vmax.f32 %v2189_v26, 0.0  ;;  %v2239_v7 = vpack.c.bf16 %v2223_v21, %v2222_v53 }
 0x3c7   : > { %v2238_v22 = vpack.c.bf16 %v2221_v31, %v2220_v6 }
 0x3c9   : > { %3636 = vmatprep.mubr.msk.bf16.mxu0 %vm1710_vm5, %v2238_v22 }
 0x3ca   : > { %3637 = vmatmul.mubr.msk.bf16.gmra.mxu0 %vm1710_vm5, %v2239_v7 }
 0x452   : > { %v3610_v38 = vpop.f32.mrf.mxu0 }
 0x453   : > { %v4365_v41 = vadd.f32 %v3610_v38, %v4362_v25 }
 0x454   : > { %v2361_v36 = vpop.f32.mrf.mxu0 }
 0x455   : > { %v4371_v24 = vadd.f32 %v4362_v25, %v2361_v36 }
 0x456   : > { %v3611_v55 = vpop.f32.mrf.mxu0 }
 0x457   : > { %v4368_v27 = vadd.f32 %v3611_v55, %v4362_v25 }
 0x458   : > { %v2364_v29 = vpop.f32.mrf.mxu0 }
 0x459   : > { %v2497_v30 = vpack.c.bf16 %v4368_v27, %v4365_v41  ;;  %v4376_v32 = vadd.f32 %v4362_v25, %v2364_v29 }
 0x45a   : > { %v3614_v44 = vpop.f32.mrf.mxu0 }
 0x45b   : > { %v2496_v46 = vpack.c.bf16 %v4376_v32, %v4371_v24  ;;  %v4381_v35 = vadd.f32 %v3614_v44, %v4362_v25  ;;  %v2490_v24 = vld [vmem:[#allocation3 + $0x10] sm:$0xff] }
 0x45c   : > { %v2377_v51 = vpop.f32.mrf.mxu0 }
 0x45d   : > { %v4387_v34 = vadd.f32 %v4362_v25, %v2377_v51 }
 0x45e   : > { %v3615_v33 = vpop.f32.mrf.mxu0 }
 0x45f   : > { %v4384_v37 = vadd.f32 %v3615_v33, %v4362_v25 }
 0x460   : > { %v2380_v39 = vpop.f32.mrf.mxu0 }
 0x461   : > { %v2499_v48 = vpack.c.bf16 %v4384_v37, %v4381_v35  ;;  %v4392_v40 = vadd.f32 %v4362_v25, %v2380_v39  ;;  %v3778_v35 = vld [vmem:[%s4016_s26] ss:$8 sps:$4 sm:$0xff]   ;;  %v3781_v37 = vld [vmem:[%s4016_s26 + $0x14] ss:$8 sps:$4 sm:$0xff]  }
 0x462   : > { %v3618_v42 = vpop.f32.mrf.mxu0 }
 0x463   : > { %v2498_v49 = vpack.c.bf16 %v4392_v40, %v4387_v34  ;;  %v2402_v7 = vadd.f32 %v3618_v42, %v4362_v25  ;;  %v2488_v40 = vld [vmem:[#allocation3] sm:$0xff] }
 0x464   : > { %v2393_v45 = vpop.f32.mrf.mxu0 }
 0x465   : > { %v2394_v44 = vadd.f32 %v4362_v25, %v2393_v45 }
 0x466   : > { %v3619_v47 = vpop.f32.mrf.mxu0 }
 0x467   : > { %v2405_v6 = vadd.f32 %v3619_v47, %v4362_v25 }
 0x468   : > { %v2396_v52 = vpop.f32.mrf.mxu0 }
 0x469   : > { %v2501_v38 = vpack.c.bf16 %v2405_v6, %v2402_v7  ;;  %v2397_v36 = vadd.f32 %v4362_v25, %v2396_v52 }
 0x46a   : > { %v3622_v56 = vpop.f32.mrf.mxu0 }
 0x46b   : > { %v2418_v14 = vadd.f32 %v3622_v56, %v4362_v25  ;;  %v2500_v33 = vpack.c.bf16 %v2397_v36, %v2394_v44 }
 0x46c   : > { %v2409_v59 = vpop.f32.mrf.mxu0 }
 0x46d   : > { %v2410_v26 = vadd.f32 %v4362_v25, %v2409_v59 }
 0x46e   : > { %v3623_v60 = vpop.f32.mrf.mxu0 }
 0x46f   : > { %v2421_v11 = vadd.f32 %v3623_v60, %v4362_v25 }
 0x470   : > { %v2412_v62 = vpop.f32.mrf.mxu0 }
 0x471   : > { %v2503_v18 = vpack.c.bf16 %v2421_v11, %v2418_v14  ;;  %v2413_v19 = vadd.f32 %v4362_v25, %v2412_v62 }
 0x472   : > { %v3626_v50 = vpop.f32.mrf.mxu0 }
 0x473   : > { %v2502_v31 = vpack.c.bf16 %v2413_v19, %v2410_v26  ;;  %v2434_v45 = vadd.f32 %v3626_v50, %v4362_v25 }
 0x474   : > { %v2425_v57 = vpop.f32.mrf.mxu0 }
 0x475   : > { %v2426_v62 = vadd.f32 %v4362_v25, %v2425_v57 }
 0x476   : > { %v3627_v61 = vpop.f32.mrf.mxu0 }
 0x477   : > { %v2437_v52 = vadd.f32 %v3627_v61, %v4362_v25 }
 0x478   : > { %v2428_v0 = vpop.f32.mrf.mxu0 }
 0x479   : > { %v2505_v59 = vpack.c.bf16 %v2437_v52, %v2434_v45  ;;  %v2429_v60 = vadd.f32 %v4362_v25, %v2428_v0  ;;  %v2489_v0 = vld [vmem:[#allocation3 + $0x8] sm:$0xff] }
 0x47a   : > { %v3630_v1 = vpop.f32.mrf.mxu0 }
 0x47b   : > { %v2450_v51 = vadd.f32 %v3630_v1, %v4362_v25  ;;  %v2504_v61 = vpack.c.bf16 %v2429_v60, %v2426_v62 }
 0x47c   : > { %v2441_v2 = vpop.f32.mrf.mxu0 }
 0x47d   : > { %v2442_v47 = vadd.f32 %v4362_v25, %v2441_v2 }
 0x47e   : > { %v3631_v4 = vpop.f32.mrf.mxu0 }
 0x47f   : > { %v2453_v55 = vadd.f32 %v3631_v4, %v4362_v25 }
 0x480   : > { %v2444_v5 = vpop.f32.mrf.mxu0 }
 0x481   : > { %v2507_v39 = vpack.c.bf16 %v2453_v55, %v2450_v51  ;;  %v2445_v42 = vadd.f32 %v4362_v25, %v2444_v5  ;;  %v2491_v5 = vld [vmem:[#allocation3 + $0x18] sm:$0xff] }
 0x482   : > { %v3634_v8 = vpop.f32.mrf.mxu0 }
 0x483   : > { %v2466_v21 = vadd.f32 %v3634_v8, %v4362_v25  ;;  %v2506_v56 = vpack.c.bf16 %v2445_v42, %v2442_v47 }
 0x484   : > { %v2457_v54 = vpop.f32.mrf.mxu0 }
 0x485   : > { %v2458_v23 = vadd.f32 %v4362_v25, %v2457_v54 }
 0x486   : > { %v3635_v10 = vpop.f32.mrf.mxu0 }
 0x487   : > { %v2469_v28 = vadd.f32 %v3635_v10, %v4362_v25 }
 0x488   : > { %v2460_v43 = vpop.f32.mrf.mxu0 }
 0x489   : > { %v2509_v53 = vpack.c.bf16 %v2469_v28, %v2466_v21  ;;  %v2461_v22 = vadd.f32 %v4362_v25, %v2460_v43 }
 0x48a   : > { %v3638_v9 = vpop.f32.mrf.mxu0 }
 0x48b   : > { %v2482_v13 = vadd.f32 %v3638_v9, %v4362_v25  ;;  %v2508_v29 = vpack.c.bf16 %v2461_v22, %v2458_v23 }
 0x48c   : > { %v2473_v58 = vpop.f32.mrf.mxu0 }
 0x48d   : > { %v2474_v63 = vadd.f32 %v4362_v25, %v2473_v58 }
 0x48e   : > { %v3639_v12 = vpop.f32.mrf.mxu0 }
 0x48f   : > { %v2485_v3 = vadd.f32 %v3639_v12, %v4362_v25 }
 0x490   : > { %v2476_v15 = vpop.f32.mrf.mxu0 }
 0x491   : > { %v2511_v16 = vpack.c.bf16 %v2485_v3, %v2482_v13  ;;  %v2477_v17 = vadd.f32 %v4362_v25, %v2476_v15 }
 0x493   : > { %v2510_v20 = vpack.c.bf16 %v2477_v17, %v2474_v63  ;;  %3378 = vmatprep.subr.bf16.mxu1 %v2511_v16 }
 0x494   : > { %3379 = vmatpush3.bf16.msra.mxu1 %v2503_v18 }
 0x495   : > { %3380 = vmatprep.subr.bf16.mxu1 %v2510_v20 }
 0x498   : > { %3381 = vmatpush3.bf16.msra.mxu1 %v2502_v31 }
 0x499   : > { %3382 = vmatprep.subr.bf16.mxu1 %v2509_v53 }
 0x49c   : > { %3383 = vmatpush3.bf16.msra.mxu1 %v2501_v38 }
 0x49d   : > { %3384 = vmatprep.subr.bf16.mxu1 %v2508_v29 }
 0x4a0   : > { %3385 = vmatpush3.bf16.msra.mxu1 %v2500_v33 }
 0x4a1   : > { %3386 = vmatprep.subr.bf16.mxu1 %v2507_v39 }
 0x4a4   : > { %3387 = vmatpush3.bf16.msra.mxu1 %v2499_v48  ;;  %v3783_v48 = vld [vmem:[%s4016_s26 + $0x10] ss:$8 sps:$4 sm:$0xff]  }
 0x4a5   : > { %3388 = vmatprep.subr.bf16.mxu1 %v2506_v56 }
 0x4a8   : > { %3389 = vmatpush3.bf16.msra.mxu1 %v2498_v49 }
 0x4a9   : > { %3390 = vmatprep.subr.bf16.mxu1 %v2505_v59 }
 0x4ac   : > { %3391 = vmatpush3.bf16.msra.mxu1 %v2497_v30 }
 0x4ad   : > { %3392 = vmatprep.subr.bf16.mxu1 %v2504_v61 }
 0x4b0   : > { %3393 = vmatpush3.bf16.msra.mxu1 %v2496_v46 }
 0x4b3   : > { %2565 = vmatmul.mubr.bf16.vlgmr.msra.gmra.mxu1 %v3778_v35 }
 0x4b4   : > { %2572 = vmatprep.mubr.bf16.mxu1 %v3781_v37 }
 0x4bb   : > { %2573 = vmatmul.mubr.bf16.gmra.mxu1 %v3783_v48 }
 0x573   : > { %v3394_v34 = vpop.f32.mrf.mxu1 }
 0x575   : > { %v3395_v25 = vpop.f32.mrf.mxu1 }
 0x576   : > { %v3396_v49 = vadd.f32 %v3395_v25, %v3394_v34 }
 0x577   : > { %v3397_v50 = vpop.f32.mrf.mxu1 }
 0x578   : > { %v2581_v57 = vadd.f32 %v3396_v49, %v2488_v40 }
 0x579   : > { %v3398_v41 = vpop.f32.mrf.mxu1 }
 0x57a   : > { %2585 = vst.msk [vmem:[#allocation3] sm:$0xff] %vm1710_vm5, %v2581_v57  ;;  %v3399_v27 = vadd.f32 %v3398_v41, %v3397_v50 }
 0x57b   : > { %v3400_v30 = vpop.f32.mrf.mxu1 }
 0x57c   : > { %v2582_v1 = vadd.f32 %v3399_v27, %v2489_v0 }
 0x57d   : > { %v3401_v32 = vpop.f32.mrf.mxu1 }
 0x57e   : > { %2586 = vst.msk [vmem:[#allocation3 + $0x8] sm:$0xff] %vm1710_vm5, %v2582_v1  ;;  %v3402_v46 = vadd.f32 %v3401_v32, %v3400_v30 }
 0x57f   : > { %v3403_v2 = vpop.f32.mrf.mxu1 }
 0x580   : > { %v2583_v4 = vadd.f32 %v3402_v46, %v2490_v24 }
 0x581   : > { %v3404_v8 = vpop.f32.mrf.mxu1 }
 0x582   : > { %2587 = vst.msk [vmem:[#allocation3 + $0x10] sm:$0xff] %vm1710_vm5, %v2583_v4  ;;  %v3405_v54 = vadd.f32 %v3404_v8, %v3403_v2  ;;  %2592 = sbr.rel (%p3235_p10) target bundleno = 2252 (0x8cc), region = 150 }
 0x584   : > { %v2584_v10 = vadd.f32 %v3405_v54, %v2491_v5 }
 0x586   : > { %2588 = vst.msk [vmem:[#allocation3 + $0x18] sm:$0xff] %vm1710_vm5, %v2584_v10 }
 0x587   : > { %v3784_v43 = vld [vmem:[%s4547_s13 + $0x18] sm:$0xff]   ;;  %v3785_v9 = vld [vmem:[%s4547_s13 + $0x10] sm:$0xff]   ;;  %v3786_v58 = vld [vmem:[%s4547_s13 + $0x8] sm:$0xff]  }
 0x588   : > { %3640 = vmatprep.subr.bf16.mxu0 %v3784_v43  ;;  %v2593_v11 = vld [vmem:[#allocation3] sm:$0xff]  ;;  %v2594_v12 = vld [vmem:[#allocation3 + $0x8] sm:$0xff]  ;;  %v3787_v3 = vld [vmem:[%s4547_s13] sm:$0xff]  }
 0x589   : > { %3641 = vmatpush3.bf16.msra.mxu0 %v3784_v43  ;;  %v2597_v13 = vpack.c.bf16 %v2594_v12, %v2593_v11  ;;  %v3788_v14 = vld [vmem:[%s4549_s15 + $0x18] sm:$0xff]   ;;  %v2595_v15 = vld [vmem:[#allocation3 + $0x10] sm:$0xff]  ;;  %v3789_v17 = vld [vmem:[%s4549_s15 + $0x10] sm:$0xff]  }
 0x58a   : > { %3642 = vmatprep.subr.bf16.mxu0 %v3785_v9  ;;  %3652 = vmatprep.subr.bf16.mxu1 %v3788_v14  ;;  %v3790_v18 = vld [vmem:[%s4549_s15 + $0x8] sm:$0xff]   ;;  %v3791_v19 = vld [vmem:[%s4549_s15] sm:$0xff]   ;;  %v3792_v28 = vld [vmem:[%s4551_s17 + $0x18] sm:$0xff]  }
 0x58b   : > { %3648 = vmatprep.mubr.msk.bf16.mxu0 %vm1710_vm5, %v2597_v13  ;;  %3653 = vmatpush3.bf16.msra.mxu1 %v3788_v14  ;;  %v3236_v21 = vld [vmem:[%s4548_s14] ss:$0 sm:$0xff]  ;;  %v3793_v33 = vld [vmem:[%s4551_s17 + $0x10] sm:$0xff]   ;;  %v3794_v39 = vld [vmem:[%s4551_s17 + $0x8] sm:$0xff]  }
 0x58c   : > { %3654 = vmatprep.subr.bf16.mxu1 %v3789_v17  ;;  %v3795_v42 = vld [vmem:[%s4551_s17] sm:$0xff]   ;;  %v3796_v47 = vld [vmem:[%s4553_s19 + $0x18] sm:$0xff]   ;;  %v3797_v40 = vld [vmem:[%s4553_s19 + $0x10] sm:$0xff]  }
 0x58d   : > { %3643 = vmatpush3.bf16.msra.mxu0 %v3785_v9  ;;  %v2596_v63 = vld [vmem:[#allocation3 + $0x18] sm:$0xff]  ;;  %v3243_v59 = vld [vmem:[%s4550_s16] ss:$0 sm:$0xff] }
 0x58e   : > { %3644 = vmatprep.subr.bf16.mxu0 %v3786_v58  ;;  %v2598_v16 = vpack.c.bf16 %v2596_v63, %v2595_v15  ;;  %v3798_v25 = vld [vmem:[%s4553_s19 + $0x8] sm:$0xff]   ;;  %v3799_v49 = vld [vmem:[%s4553_s19] sm:$0xff]  }
 0x58f   : > { %3655 = vmatpush3.bf16.msra.mxu1 %v3789_v17  ;;  %v3250_v0 = vld [vmem:[%s4552_s18] ss:$0 sm:$0xff] }
 0x590   : > { %3656 = vmatprep.subr.bf16.mxu1 %v3790_v18  ;;  %v3257_v10 = vld [vmem:[%s4577_s0] ss:$0 sm:$0xff] }
 0x591   : > { %3645 = vmatpush3.bf16.msra.mxu0 %v3786_v58 }
 0x592   : > { %3646 = vmatprep.subr.bf16.mxu0 %v3787_v3 }
 0x593   : > { %3657 = vmatpush3.bf16.msra.mxu1 %v3790_v18 }
 0x594   : > { %3658 = vmatprep.subr.bf16.mxu1 %v3791_v19 }
 0x595   : > { %3647 = vmatpush3.bf16.msra.mxu0 %v3787_v3 }
 0x596   : > { %3664 = vmatprep.subr.bf16.mxu0 %v3792_v28 }
 0x597   : > { %3659 = vmatpush3.bf16.msra.mxu1 %v3791_v19 }
 0x598   : > { %3649 = vmatmul.mubr.msk.bf16.vlgmr.msra.gmra.mxu0 %vm1710_vm5, %v2598_v16  ;;  %3676 = vmatprep.subr.bf16.mxu1 %v3796_v47 }
 0x599   : > { %3665 = vmatpush3.bf16.msra.mxu0 %v3792_v28 }
 0x59a   : > { %3666 = vmatprep.subr.bf16.mxu0 %v3793_v33 }
 0x59d   : > { %3667 = vmatpush3.bf16.msra.mxu0 %v3793_v33 }
 0x59e   : > { %3668 = vmatprep.subr.bf16.mxu0 %v3794_v39 }
 0x5a1   : > { %3669 = vmatpush3.bf16.msra.mxu0 %v3794_v39 }
 0x5a2   : > { %3670 = vmatprep.subr.bf16.mxu0 %v3795_v42 }
 0x5a5   : > { %3671 = vmatpush3.bf16.msra.mxu0 %v3795_v42 }
 0x658   : > { %v3650_v20 = vpop.f32.mrf.mxu0 }
 0x659   : > { %v2687_v22 = vadd.f32 %v3650_v20, %v3236_v21 }
 0x65a   : > { %v2678_v26 = vpop.f32.mrf.mxu0 }
 0x65b   : > { %v2679_v31 = vadd.f32 %v3236_v21, %v2678_v26  ;;  %v2695_v29 = vmax.f32 %v2687_v22, 0.0 }
 0x65c   : > { %v3651_v6 = vpop.f32.mrf.mxu0 }
 0x65d   : > { %v2690_v53 = vadd.f32 %v3651_v6, %v3236_v21  ;;  %v2693_v36 = vmax.f32 %v2679_v31, 0.0 }
 0x65e   : > { %v2681_v7 = vpop.f32.mrf.mxu0 }
 0x65f   : > { %v2682_v23 = vadd.f32 %v3236_v21, %v2681_v7  ;;  %v2696_v38 = vmax.f32 %v2690_v53, 0.0 }
 0x661   : > { %v2694_v55 = vmax.f32 %v2682_v23, 0.0  ;;  %v2698_v51 = vpack.c.bf16 %v2696_v38, %v2695_v29 }
 0x663   : > { %v2697_v44 = vpack.c.bf16 %v2694_v55, %v2693_v36 }
 0x665   : > { %3660 = vmatprep.mubr.msk.bf16.mxu1 %vm1710_vm5, %v2697_v44 }
 0x666   : > { %3661 = vmatmul.mubr.msk.bf16.vlgmr.msra.gmra.mxu1 %vm1710_vm5, %v2698_v51 }
 0x667   : > { %3677 = vmatpush3.bf16.msra.mxu1 %v3796_v47 }
 0x668   : > { %3678 = vmatprep.subr.bf16.mxu1 %v3797_v40 }
 0x66b   : > { %3679 = vmatpush3.bf16.msra.mxu1 %v3797_v40 }
 0x66c   : > { %3680 = vmatprep.subr.bf16.mxu1 %v3798_v25 }
 0x66f   : > { %3681 = vmatpush3.bf16.msra.mxu1 %v3798_v25 }
 0x670   : > { %3682 = vmatprep.subr.bf16.mxu1 %v3799_v49 }
 0x673   : > { %3683 = vmatpush3.bf16.msra.mxu1 %v3799_v49 }
 0x726   : > { %v3662_v52 = vpop.f32.mrf.mxu1 }
 0x727   : > { %v2787_v37 = vadd.f32 %v3662_v52, %v3243_v59 }
 0x728   : > { %v2778_v56 = vpop.f32.mrf.mxu1 }
 0x729   : > { %v2779_v61 = vadd.f32 %v3243_v59, %v2778_v56 }
 0x72a   : > { %v3663_v45 = vpop.f32.mrf.mxu1 }
 0x72b   : > { %v2790_v60 = vadd.f32 %v3663_v45, %v3243_v59 }
 0x72c   : > { %v2781_v62 = vpop.f32.mrf.mxu1 }
 0x72d   : > { %v2782_v35 = vadd.f32 %v3243_v59, %v2781_v62  ;;  %v2794_v34 = vpack.c.bf16 %v2790_v60, %v2787_v37 }
 0x72f   : > { %v2793_v48 = vpack.c.bf16 %v2782_v35, %v2779_v61 }
 0x731   : > { %3672 = vmatprep.mubr.msk.bf16.mxu0 %vm1710_vm5, %v2793_v48 }
 0x732   : > { %3673 = vmatmul.mubr.msk.bf16.vlgmr.msra.gmra.mxu0 %vm1710_vm5, %v2794_v34 }
 0x7f2   : > { %v3674_v50 = vpop.f32.mrf.mxu0 }
 0x7f3   : > { %v2883_v1 = vadd.f32 %v3674_v50, %v3250_v0 }
 0x7f4   : > { %v2874_v57 = vpop.f32.mrf.mxu0 }
 0x7f5   : > { %v2875_v27 = vadd.f32 %v3250_v0, %v2874_v57  ;;  %v2891_v5 = vmax.f32 %v2883_v1, 0.0 }
 0x7f6   : > { %v3675_v41 = vpop.f32.mrf.mxu0 }
 0x7f7   : > { %v2886_v30 = vadd.f32 %v3675_v41, %v3250_v0  ;;  %v2889_v2 = vmax.f32 %v2875_v27, 0.0 }
 0x7f8   : > { %v2877_v24 = vpop.f32.mrf.mxu0 }
 0x7f9   : > { %v2878_v32 = vadd.f32 %v3250_v0, %v2877_v24  ;;  %v2892_v46 = vmax.f32 %v2886_v30, 0.0 }
 0x7fb   : > { %v2890_v4 = vmax.f32 %v2878_v32, 0.0  ;;  %v2894_v54 = vpack.c.bf16 %v2892_v46, %v2891_v5 }
 0x7fd   : > { %v2893_v8 = vpack.c.bf16 %v2890_v4, %v2889_v2 }
 0x7ff   : > { %3684 = vmatprep.mubr.msk.bf16.mxu1 %vm1710_vm5, %v2893_v8 }
 0x800   : > { %3685 = vmatmul.mubr.msk.bf16.vlgmr.msra.gmra.mxu1 %vm1710_vm5, %v2894_v54 }
 0x8c0   : > { %v3686_v43 = vpop.f32.mrf.mxu1 }
 0x8c1   : > { %v2983_v9 = vadd.f32 %v3686_v43, %v3257_v10 }
 0x8c2   : > { %v2974_v58 = vpop.f32.mrf.mxu1 }
 0x8c3   : > { %v2991_v11 = vmax.f32 %v2983_v9, 0.0  ;;  %v2975_v12 = vadd.f32 %v3257_v10, %v2974_v58 }
 0x8c4   : > { %v3687_v13 = vpop.f32.mrf.mxu1 }
 0x8c5   : > { %2995 = vst.msk [vmem:[#allocation5 + $0x10] sm:$0xff] %vm1710_vm5, %v2991_v11  ;;  %v2989_v3 = vmax.f32 %v2975_v12, 0.0  ;;  %v2986_v14 = vadd.f32 %v3687_v13, %v3257_v10 }
 0x8c6   : > { %v2977_v15 = vpop.f32.mrf.mxu1 }
 0x8c7   : > { %2993 = vst.msk [vmem:[#allocation5] sm:$0xff] %vm1710_vm5, %v2989_v3  ;;  %v2992_v63 = vmax.f32 %v2986_v14, 0.0  ;;  %v2978_v16 = vadd.f32 %v3257_v10, %v2977_v15 }
 0x8c9   : > { %2996 = vst.msk [vmem:[#allocation5 + $0x18] sm:$0xff] %vm1710_vm5, %v2992_v63  ;;  %v2990_v17 = vmax.f32 %v2978_v16, 0.0 }
 0x8cb   : > { %2994 = vst.msk [vmem:[#allocation5 + $0x8] sm:$0xff] %vm1710_vm5, %v2990_v17 }
 0x8cc PF: > { %p3697_p11 = scmp.eq.s32.totalorder %s3982_s27, 1  ;;  %s3853_s30 = smov [#allocation5]  }
 0x8cd   : > { %s3003_s5 = sshll.u32 %s3853_s30, 4  ;;  %s3004_s5 = int_to_ptr.vmem [resolvable:$true] %s3003_s5 }
 0x8ce   : > { %s3800_s20 = scalar_lea.vmem %s3004_s5, 512  ;;  %p3807_p1 = scmp.lt.s32.totalorder %s3004_s5, %s3004_s5 }
 0x8cf   : > { %p3801_p12 = scmp.ne.s32.totalorder %s3004_s5, %s3800_s20  ;;  %p3808_p2 = scmp.lt.s32.totalorder %s3800_s20, %s3800_s20 }
 0x8d1   : > { %p3802_p13 = pnand %p3801_p12, %p3697_p11  ;;  %p3809_p3 = por %p3808_p2, %p3807_p1 }
 0x8d3   : > { %p3803_p0 = pneg %p3802_p13 }
 0x8d5   : > { %p3810_p4 = pnand %p3809_p3, %p3803_p0 }
 0x8d7   : > { %3813 = shalt.err (!%p3810_p4)
}
 0x8d8   : > { %s3854_s21 = smov 128   ;;  %s3855_s26 = smov 8  }
 0x8d9   : > { %s4578_s2 = sld [smem:[#allocation18_spill]] }
 0x8df   : > { %3694 = dma.vmem_to_hbm [thread:$0]  (%p3697_p11), %s3004_s5, 512, %s4578_s2, [#allocation6], %s3854_s21, %s3854_s21, %s3855_s26  }
 0x8e0   : > { %3837 = dma.done.wait (%p3697_p11), [#allocation6], 512  }
 0x8e1   : > { %3839 = vsyncadd (%p3697_p11), [#allocation6], 4294966784 }
 0x8e2 PF: > { %s4579_s26 = sld [smem:[#allocation9_spill]] }
 0x8e3   : > { %s4580_s2 = sld [smem:[#allocation8_spill]] }
 0x8e4   : > { %s4581_s25 = sld [smem:[#allocation10_spill]] }
 0x8e8   : > { %p29_p5 = scmp.ge.s32.totalorder %s4579_s26, 4  }
 0x8ea   :  { %31 = sbr.rel (!%p29_p5) target bundleno = 11 (0xb), region = 188 }
 0x8ef   :  { %3019 = vsyncpa [#allocation6], 1 }
 0x8f0   :  { %3021 = vsyncpa [#allocation6 + $0x1], 1 }

</bundles_post_ra>
